<compile_context>
chip_gen: v7x
topology: tpu7x:2x2x1
jax: 0.10.0
libtpu: 0.0.40
codegen_flags: <defaults>
</compile_context>

<pallas_src>
import jax
import jax.numpy as jnp
from jax import lax
from jax.experimental import pallas as pl
from jax.experimental.pallas import tpu as pltpu


def coordatt_kernel(x_ref, ph_ref, pw_ref, w1h_ref, w1w_ref, b1_ref,
                    wh_ref, bh_ref, ww_ref, bw_ref, o_ref):
    nb = x_ref.shape[0]
    out_dtype = o_ref.dtype
    # bf16 I/O -> gate expansion + final multiply in bf16 (exact 0/1 selection).
    gate_dtype = jnp.bfloat16 if out_dtype == jnp.bfloat16 else jnp.float32

    ph = ph_ref[...]          # (HW, H) 0/1: ph[h*W + w, h] = 1
    pw = pw_ref[...]          # (HW, W) 0/1: pw[h*W + w, w] = 1
    w1h = w1h_ref[...]
    w1w = w1w_ref[...]
    b1 = b1_ref[...]
    wh = wh_ref[...]
    bh = bh_ref[...]
    ww = ww_ref[...]
    bw = bw_ref[...]

    # Short unrolled batch loop (nb images per grid step) amortizes per-step
    # overhead; every iteration is plain 2-D MXU matmuls + VPU elementwise.
    for b in range(nb):
        xf = x_ref[b]                                             # (C, HW), lane-dense

        # -- coordinate pooling via MXU (flat layout, no XLU relayout). Sums;
        #    the 1/W and 1/H mean divisors are folded into w1h / w1w.
        xh = jnp.dot(xf, ph, preferred_element_type=jnp.float32)  # (C, H)
        xw = jnp.dot(xf, pw, preferred_element_type=jnp.float32)  # (C, W)

        # -- conv1 (1x1) with folded eval-mode BN + h_swish, per half
        #    (identical to conv1 on the concatenated tensor; no concat/split).
        yh = jnp.dot(w1h, xh, preferred_element_type=jnp.float32) + b1
        yw = jnp.dot(w1w, xw, preferred_element_type=jnp.float32) + b1
        yh = yh * (jnp.clip(yh + 3.0, 0.0, 6.0) * (1.0 / 6.0))    # h_swish
        yw = yw * (jnp.clip(yw + 3.0, 0.0, 6.0) * (1.0 / 6.0))

        # -- conv_h / conv_w (1x1) + sigmoid -> per-axis gates.
        a_h = jax.nn.sigmoid(
            jnp.dot(wh, yh, preferred_element_type=jnp.float32) + bh)  # (oup, H)
        a_w = jax.nn.sigmoid(
            jnp.dot(ww, yw, preferred_element_type=jnp.float32) + bw)  # (oup, W)

        # -- expand gates to (oup, HW) via MXU (exactly one 1 per row of ph/pw,
        #    so this is an exact broadcast; avoids XLU tile/relayout).
        gate_h = lax.dot_general(a_h.astype(ph.dtype), ph,
                                 (((1,), (1,)), ((), ())),
                                 preferred_element_type=gate_dtype)    # (oup, HW)
        gate_w = lax.dot_general(a_w.astype(pw.dtype), pw,
                                 (((1,), (1,)), ((), ())),
                                 preferred_element_type=gate_dtype)    # (oup, HW)

        # -- gated output: identity * a_w * a_h (lane-dense store).
        o_ref[b] = (xf.astype(gate_dtype) * gate_w * gate_h).astype(out_dtype)


def coord_att(x, params):
    """x: (N, C, H, W); params: dict from make_params (eval-mode BN folded)."""
    N, C, H, W = x.shape
    HW = H * W
    w1, b1, bns, bnt, wh, bh, ww, bw = (
        params["w1"], params["b1"], params["bn_scale"], params["bn_shift"],
        params["wh"], params["bh"], params["ww"], params["bw"])
    mip = w1.shape[0]
    oup = wh.shape[0]
    assert oup == C, "CoordAtt gating requires oup == inp (identity * gates)"

    # Free, contiguous reshape in HBM: the lane axis becomes H*W (lane-dense
    # as long as HW >= 128).
    # TODO(synk): for HW < 128 (tiny late-stage maps), fold several batch
    # images into the lane axis on the host so stores stay unmasked.
    x_flat = x.reshape(N, C, HW)

    # Host-side constant folding:
    #   BN(conv1(mean(x))) == (bn_scale*w1/len) @ sum(x) + (bn_scale*b1 + bn_shift)
    w1h = ((bns * w1) / W).astype(jnp.float32)   # H-indexed half (mean over W -> /W)
    w1w = ((bns * w1) / H).astype(jnp.float32)   # W-indexed half (mean over H -> /H)
    b1f = (bns * b1 + bnt).astype(jnp.float32)   # (mip, 1)

    # Constant 0/1 pooling / broadcast-selection matrices. Constant block index
    # across the grid -> fetched once; single-buffered via pl.Buffered(1).
    s = jnp.arange(HW)
    ph = (s[:, None] // W == jnp.arange(H)[None, :]).astype(x.dtype)   # (HW, H)
    pw = (s[:, None] % W == jnp.arange(W)[None, :]).astype(x.dtype)    # (HW, W)

    itemsize = jnp.dtype(x.dtype).itemsize
    gate_itemsize = 2 if x.dtype == jnp.bfloat16 else 4
    per_image_in = C * HW * itemsize
    per_image_out = oup * HW * itemsize

    # Multi-batch blocking: several images per grid step when per-image blocks
    # are small. Target ~6 MiB per input block; keep the unrolled loop short.
    target_block = 6 << 20
    nb = int(max(1, min(N, 8, target_block // max(per_image_in, 1))))
    while N % nb:
        nb -= 1
    # TODO(synk): per-image blocks > ~12 MiB (early-network resolutions) need a
    # spatially tiled two-pass variant (pool pass, then gate pass) instead of
    # relying on the VMEM clamp; the same split would also keep both v7x
    # TensorCores busy when N == 1.

    in_block = nb * per_image_in
    out_block = nb * per_image_out
    pool_bytes = HW * (H + W) * itemsize
    weight_bytes = (2 * mip * C + 2 * oup * mip + mip + 2 * oup) * 4

    # VMEM budget: double-buffered x/out blocks + single-buffered constants +
    # in-kernel gate temporaries (conservatively assumed live across the whole
    # unrolled batch loop) + headroom for Mosaic internal scratch.
    inter_bytes = 2 * nb * oup * HW * gate_itemsize
    budget = (2 * (in_block + out_block) + pool_bytes + weight_bytes
              + inter_bytes + (2 << 20))
    try:
        phys_vmem = int(getattr(pltpu.get_tpu_info(), "vmem_capacity_bytes",
                                64 << 20))
    except Exception:
        phys_vmem = 64 << 20            # v7x per-TC size: safe lower bound
    vmem_cap = int(phys_vmem * 4 // 5)  # leave headroom below physical VMEM
    vmem_limit = int(min(max(budget, 32 << 20), vmem_cap))

    # Memory-bound kernel: ~2*N*C*HW*itemsize of HBM traffic, tiny FLOPs.
    cost = pl.CostEstimate(
        flops=int(2 * N * ((C + oup) * HW * (H + W)
                           + (mip * C + oup * mip) * (H + W)) + 2 * N * C * HW),
        transcendentals=int(N * oup * (H + W)),
        bytes_accessed=int(2 * N * C * HW * itemsize + pool_bytes + weight_bytes),
    )

    grid = (N // nb,)
    out_shape = jax.ShapeDtypeStruct((N, oup, HW), x.dtype)

    def build(single_buffer_consts):
        const_kwargs = ({"pipeline_mode": pl.Buffered(1)}
                        if single_buffer_consts else {})
        const2d = lambda shape: pl.BlockSpec(shape, lambda n: (0, 0),
                                             **const_kwargs)
        return pl.pallas_call(
            coordatt_kernel,
            out_shape=out_shape,
            grid_spec=pltpu.PrefetchScalarGridSpec(
                num_scalar_prefetch=0,
                grid=grid,
                in_specs=[
                    pl.BlockSpec((nb, C, HW), lambda n: (n, 0, 0)),  # x (flat)
                    const2d((HW, H)),      # H-selection / broadcast matrix
                    const2d((HW, W)),      # W-selection / broadcast matrix
                    const2d((mip, C)),     # fused conv1+BN weight (H half)
                    const2d((mip, C)),     # fused conv1+BN weight (W half)
                    const2d((mip, 1)),     # fused conv1 bias + BN shift
                    const2d((oup, mip)),   # conv_h weight
                    const2d((oup, 1)),     # conv_h bias
                    const2d((oup, mip)),   # conv_w weight
                    const2d((oup, 1)),     # conv_w bias
                ],
                out_specs=pl.BlockSpec((nb, oup, HW), lambda n: (n, 0, 0)),
            ),
            compiler_params=pltpu.CompilerParams(
                dimension_semantics=("parallel",),
                vmem_limit_bytes=vmem_limit),
            cost_estimate=cost,
        )

    args = (x_flat, ph, pw, w1h, w1w, b1f, wh, bh, ww, bw)
    try:
        out_flat = build(True)(*args)
    except Exception:
        # Fallback for Pallas versions without single-buffer pipeline_mode.
        out_flat = build(False)(*args)

    return out_flat.reshape(N, oup, H, W)


def make_params(key, inp, oup, reduction=32):
    mip = max(8, inp // reduction)
    ks = jax.random.split(key, 8)
    eps = 1e-5
    # BN params (deterministic, non-trivial), folded as eval-mode running stats.
    gamma = 1.0 + 0.1 * jnp.arange(mip, dtype=jnp.float32)
    beta = 0.05 * jnp.arange(mip, dtype=jnp.float32)
    running_mean = 0.01 * jnp.arange(mip, dtype=jnp.float32)
    running_var = 1.0 + 0.02 * jnp.arange(mip, dtype=jnp.float32)
    bn_scale = gamma / jnp.sqrt(running_var + eps)
    bn_shift = beta - running_mean * bn_scale
    return {
        "w1": 0.1 * jax.random.normal(ks[0], (mip, inp), jnp.float32),
        "b1": 0.1 * jax.random.normal(ks[1], (mip, 1), jnp.float32),
        "bn_scale": bn_scale.reshape(mip, 1),
        "bn_shift": bn_shift.reshape(mip, 1),
        "wh": 0.1 * jax.random.normal(ks[2], (oup, mip), jnp.float32),
        "bh": 0.1 * jax.random.normal(ks[3], (oup, 1), jnp.float32),
        "ww": 0.1 * jax.random.normal(ks[4], (oup, mip), jnp.float32),
        "bw": 0.1 * jax.random.normal(ks[5], (oup, 1), jnp.float32),
    }


def coord_att_reference(x, p):
    """Pure-JAX reference mirroring the PyTorch forward (eval-mode BN)."""
    N, C, H, W = x.shape
    x_h = jnp.mean(x, axis=3)                       # (N, C, H)
    x_w = jnp.mean(x, axis=2)                       # (N, C, W)
    y = jnp.concatenate([x_h, x_w], axis=2)         # (N, C, H+W)
    y1 = jnp.einsum("mc,ncs->nms", p["w1"], y) + p["b1"][None]
    y1 = y1 * p["bn_scale"][None] + p["bn_shift"][None]
    y1 = y1 * (jnp.clip(y1 + 3.0, 0.0, 6.0) / 6.0)
    yh, yw = y1[:, :, :H], y1[:, :, H:]
    a_h = jax.nn.sigmoid(jnp.einsum("om,nms->nos", p["wh"], yh) + p["bh"][None])  # (N,oup,H)
    a_w = jax.nn.sigmoid(jnp.einsum("om,nms->nos", p["ww"], yw) + p["bw"][None])  # (N,oup,W)
    return x * a_w[:, :, None, :] * a_h[:, :, :, None]


if __name__ == "__main__":
    N, C, H, W = 2, 4, 16, 16
    inp = oup = C
    key = jax.random.PRNGKey(0)
    kx, kp = jax.random.split(key)
    x = jax.random.normal(kx, (N, C, H, W), jnp.float32)
    params = make_params(kp, inp, oup, reduction=32)

    ref = coord_att_reference(x, params)

    # f32 path
    out = jax.block_until_ready(coord_att(x, params))
    assert out.shape == (N, oup, H, W)
    assert jnp.allclose(out, ref, atol=1e-4, rtol=1e-4), "f32 mismatch vs reference"

    # bf16 I/O path (halves HBM traffic; matmul accumulation still f32, gate
    # expansion/multiply in bf16 -> ~2-3 decimal digits of gate precision).
    out_bf16 = jax.block_until_ready(coord_att(x.astype(jnp.bfloat16), params))
    assert out_bf16.dtype == jnp.bfloat16
    assert jnp.allclose(out_bf16.astype(jnp.float32), ref, atol=5e-2, rtol=5e-2), \
        "bf16 mismatch vs reference"

    print("KERNEL_OK")
</pallas_src>

<mosaic_0001>
module attributes {stable_mosaic.version = 11 : i64} {
  func.func @coordatt_kernel(%arg0: i32, %arg1: memref<2x4x256xf32, #tpu.memory_space<vmem>>, %arg2: memref<256x16xf32, #tpu.memory_space<vmem>>, %arg3: memref<256x16xf32, #tpu.memory_space<vmem>>, %arg4: memref<8x4xf32, #tpu.memory_space<vmem>>, %arg5: memref<8x4xf32, #tpu.memory_space<vmem>>, %arg6: memref<8x1xf32, #tpu.memory_space<vmem>>, %arg7: memref<4x8xf32, #tpu.memory_space<vmem>>, %arg8: memref<4x1xf32, #tpu.memory_space<vmem>>, %arg9: memref<4x8xf32, #tpu.memory_space<vmem>>, %arg10: memref<4x1xf32, #tpu.memory_space<vmem>>, %arg11: memref<2x4x256xf32, #tpu.memory_space<vmem>>) attributes {dimension_semantics = [#tpu.dimension_semantics<parallel>], iteration_bounds = array<i64: 1>, scalar_prefetch = 0 : i64, scratch_operands = 0 : i64, tpu.core_type = #tpu.core_type<tc>, window_params = [{transform_indices = @transform_0, window_bounds = array<i64: 2, 4, 256>}, {pipeline_mode = #tpu.pipeline_mode<synchronous>, transform_indices = @transform_1, window_bounds = array<i64: 256, 16>}, {pipeline_mode = #tpu.pipeline_mode<synchronous>, transform_indices = @transform_2, window_bounds = array<i64: 256, 16>}, {pipeline_mode = #tpu.pipeline_mode<synchronous>, transform_indices = @transform_3, window_bounds = array<i64: 8, 4>}, {pipeline_mode = #tpu.pipeline_mode<synchronous>, transform_indices = @transform_4, window_bounds = array<i64: 8, 4>}, {pipeline_mode = #tpu.pipeline_mode<synchronous>, transform_indices = @transform_5, window_bounds = array<i64: 8, 1>}, {pipeline_mode = #tpu.pipeline_mode<synchronous>, transform_indices = @transform_6, window_bounds = array<i64: 4, 8>}, {pipeline_mode = #tpu.pipeline_mode<synchronous>, transform_indices = @transform_7, window_bounds = array<i64: 4, 1>}, {pipeline_mode = #tpu.pipeline_mode<synchronous>, transform_indices = @transform_8, window_bounds = array<i64: 4, 8>}, {pipeline_mode = #tpu.pipeline_mode<synchronous>, transform_indices = @transform_9, window_bounds = array<i64: 4, 1>}, {transform_indices = @transform_10, window_bounds = array<i64: 2, 4, 256>}]} {
    %c0 = arith.constant 0 : index
    %c0_0 = arith.constant 0 : index
    %0 = vector.load %arg2[%c0, %c0_0] : memref<256x16xf32, #tpu.memory_space<vmem>>, vector<256x16xf32>
    %c0_1 = arith.constant 0 : index
    %c0_2 = arith.constant 0 : index
    %1 = vector.load %arg3[%c0_1, %c0_2] : memref<256x16xf32, #tpu.memory_space<vmem>>, vector<256x16xf32>
    %c0_3 = arith.constant 0 : index
    %c0_4 = arith.constant 0 : index
    %2 = vector.load %arg4[%c0_3, %c0_4] : memref<8x4xf32, #tpu.memory_space<vmem>>, vector<8x4xf32>
    %c0_5 = arith.constant 0 : index
    %c0_6 = arith.constant 0 : index
    %3 = vector.load %arg5[%c0_5, %c0_6] : memref<8x4xf32, #tpu.memory_space<vmem>>, vector<8x4xf32>
    %c0_7 = arith.constant 0 : index
    %c0_8 = arith.constant 0 : index
    %4 = vector.load %arg6[%c0_7, %c0_8] : memref<8x1xf32, #tpu.memory_space<vmem>>, vector<8x1xf32>
    %c0_9 = arith.constant 0 : index
    %c0_10 = arith.constant 0 : index
    %5 = vector.load %arg7[%c0_9, %c0_10] : memref<4x8xf32, #tpu.memory_space<vmem>>, vector<4x8xf32>
    %c0_11 = arith.constant 0 : index
    %c0_12 = arith.constant 0 : index
    %6 = vector.load %arg8[%c0_11, %c0_12] : memref<4x1xf32, #tpu.memory_space<vmem>>, vector<4x1xf32>
    %c0_13 = arith.constant 0 : index
    %c0_14 = arith.constant 0 : index
    %7 = vector.load %arg9[%c0_13, %c0_14] : memref<4x8xf32, #tpu.memory_space<vmem>>, vector<4x8xf32>
    %c0_15 = arith.constant 0 : index
    %c0_16 = arith.constant 0 : index
    %8 = vector.load %arg10[%c0_15, %c0_16] : memref<4x1xf32, #tpu.memory_space<vmem>>, vector<4x1xf32>
    %c0_17 = arith.constant 0 : index
    %c0_18 = arith.constant 0 : index
    %c0_19 = arith.constant 0 : index
    %9 = vector.load %arg1[%c0_17, %c0_18, %c0_19] : memref<2x4x256xf32, #tpu.memory_space<vmem>>, vector<1x4x256xf32>
    %10 = vector.shape_cast %9 : vector<1x4x256xf32> to vector<4x256xf32>
    %cst = arith.constant dense<0.000000e+00> : vector<4x16xf32>
    %11 = tpu.matmul %10, %0, %cst {dimension_numbers = #tpu.dot_dimension_numbers<[1], [0], [0], [1], [0, 0, 1, 1], [], []>} : vector<4x256xf32>, vector<256x16xf32>, vector<4x16xf32> -> vector<4x16xf32>
    %cst_20 = arith.constant dense<0.000000e+00> : vector<4x16xf32>
    %12 = tpu.matmul %10, %1, %cst_20 {dimension_numbers = #tpu.dot_dimension_numbers<[1], [0], [0], [1], [0, 0, 1, 1], [], []>} : vector<4x256xf32>, vector<256x16xf32>, vector<4x16xf32> -> vector<4x16xf32>
    %cst_21 = arith.constant dense<0.000000e+00> : vector<8x16xf32>
    %13 = tpu.matmul %2, %11, %cst_21 {dimension_numbers = #tpu.dot_dimension_numbers<[1], [0], [0], [1], [0, 0, 1, 1], [], []>} : vector<8x4xf32>, vector<4x16xf32>, vector<8x16xf32> -> vector<8x16xf32>
    %14 = vector.broadcast %4 : vector<8x1xf32> to vector<8x16xf32>
    %15 = arith.addf %13, %14 : vector<8x16xf32>
    %cst_22 = arith.constant dense<0.000000e+00> : vector<8x16xf32>
    %16 = tpu.matmul %3, %12, %cst_22 {dimension_numbers = #tpu.dot_dimension_numbers<[1], [0], [0], [1], [0, 0, 1, 1], [], []>} : vector<8x4xf32>, vector<4x16xf32>, vector<8x16xf32> -> vector<8x16xf32>
    %17 = vector.broadcast %4 : vector<8x1xf32> to vector<8x16xf32>
    %18 = arith.addf %16, %17 : vector<8x16xf32>
    %cst_23 = arith.constant 3.000000e+00 : f32
    %19 = vector.broadcast %cst_23 : f32 to vector<8x16xf32>
    %20 = arith.addf %15, %19 : vector<8x16xf32>
    %cst_24 = arith.constant 0.000000e+00 : f32
    %cst_25 = arith.constant 6.000000e+00 : f32
    %21 = vector.broadcast %cst_24 : f32 to vector<8x16xf32>
    %22 = arith.maximumf %21, %20 : vector<8x16xf32>
    %23 = vector.broadcast %cst_25 : f32 to vector<8x16xf32>
    %24 = arith.minimumf %23, %22 : vector<8x16xf32>
    %cst_26 = arith.constant 0.166666672 : f32
    %25 = vector.broadcast %cst_26 : f32 to vector<8x16xf32>
    %26 = arith.mulf %24, %25 : vector<8x16xf32>
    %27 = arith.mulf %15, %26 : vector<8x16xf32>
    %cst_27 = arith.constant 3.000000e+00 : f32
    %28 = vector.broadcast %cst_27 : f32 to vector<8x16xf32>
    %29 = arith.addf %18, %28 : vector<8x16xf32>
    %cst_28 = arith.constant 0.000000e+00 : f32
    %cst_29 = arith.constant 6.000000e+00 : f32
    %30 = vector.broadcast %cst_28 : f32 to vector<8x16xf32>
    %31 = arith.maximumf %30, %29 : vector<8x16xf32>
    %32 = vector.broadcast %cst_29 : f32 to vector<8x16xf32>
    %33 = arith.minimumf %32, %31 : vector<8x16xf32>
    %cst_30 = arith.constant 0.166666672 : f32
    %34 = vector.broadcast %cst_30 : f32 to vector<8x16xf32>
    %35 = arith.mulf %33, %34 : vector<8x16xf32>
    %36 = arith.mulf %18, %35 : vector<8x16xf32>
    %cst_31 = arith.constant dense<0.000000e+00> : vector<4x16xf32>
    %37 = tpu.matmul %5, %27, %cst_31 {dimension_numbers = #tpu.dot_dimension_numbers<[1], [0], [0], [1], [0, 0, 1, 1], [], []>} : vector<4x8xf32>, vector<8x16xf32>, vector<4x16xf32> -> vector<4x16xf32>
    %38 = vector.broadcast %6 : vector<4x1xf32> to vector<4x16xf32>
    %39 = arith.addf %37, %38 : vector<4x16xf32>
    %40 = arith.negf %39 : vector<4x16xf32>
    %41 = math.exp %40 : vector<4x16xf32>
    %cst_32 = arith.constant 1.000000e+00 : f32
    %42 = vector.broadcast %cst_32 : f32 to vector<4x16xf32>
    %43 = arith.addf %42, %41 : vector<4x16xf32>
    %44 = arith.divf %42, %43 : vector<4x16xf32>
    %cst_33 = arith.constant dense<0.000000e+00> : vector<4x16xf32>
    %45 = tpu.matmul %7, %36, %cst_33 {dimension_numbers = #tpu.dot_dimension_numbers<[1], [0], [0], [1], [0, 0, 1, 1], [], []>} : vector<4x8xf32>, vector<8x16xf32>, vector<4x16xf32> -> vector<4x16xf32>
    %46 = vector.broadcast %8 : vector<4x1xf32> to vector<4x16xf32>
    %47 = arith.addf %45, %46 : vector<4x16xf32>
    %48 = arith.negf %47 : vector<4x16xf32>
    %49 = math.exp %48 : vector<4x16xf32>
    %cst_34 = arith.constant 1.000000e+00 : f32
    %50 = vector.broadcast %cst_34 : f32 to vector<4x16xf32>
    %51 = arith.addf %50, %49 : vector<4x16xf32>
    %52 = arith.divf %50, %51 : vector<4x16xf32>
    %cst_35 = arith.constant dense<0.000000e+00> : vector<4x256xf32>
    %53 = tpu.matmul %44, %0, %cst_35 {dimension_numbers = #tpu.dot_dimension_numbers<[1], [1], [0], [0], [0, 0, 1, 0], [], []>} : vector<4x16xf32>, vector<256x16xf32>, vector<4x256xf32> -> vector<4x256xf32>
    %cst_36 = arith.constant dense<0.000000e+00> : vector<4x256xf32>
    %54 = tpu.matmul %52, %1, %cst_36 {dimension_numbers = #tpu.dot_dimension_numbers<[1], [1], [0], [0], [0, 0, 1, 0], [], []>} : vector<4x16xf32>, vector<256x16xf32>, vector<4x256xf32> -> vector<4x256xf32>
    %55 = arith.mulf %10, %54 : vector<4x256xf32>
    %56 = arith.mulf %55, %53 : vector<4x256xf32>
    %c0_37 = arith.constant 0 : index
    %c0_38 = arith.constant 0 : index
    %c0_39 = arith.constant 0 : index
    %57 = vector.load %arg11[%c0_37, %c0_38, %c0_39] : memref<2x4x256xf32, #tpu.memory_space<vmem>>, vector<1x4x256xf32>
    %58 = vector.shape_cast %57 : vector<1x4x256xf32> to vector<4x256xf32>
    %59 = vector.shape_cast %56 : vector<4x256xf32> to vector<1x4x256xf32>
    tpu.vector_store %arg11[%c0_37, %c0_38, %c0_39], %59 {strides = array<i32>} : memref<2x4x256xf32, #tpu.memory_space<vmem>>, vector<1x4x256xf32>,
    %c1 = arith.constant 1 : index
    %c0_40 = arith.constant 0 : index
    %c0_41 = arith.constant 0 : index
    %60 = vector.load %arg1[%c1, %c0_40, %c0_41] : memref<2x4x256xf32, #tpu.memory_space<vmem>>, vector<1x4x256xf32>
    %61 = vector.shape_cast %60 : vector<1x4x256xf32> to vector<4x256xf32>
    %cst_42 = arith.constant dense<0.000000e+00> : vector<4x16xf32>
    %62 = tpu.matmul %61, %0, %cst_42 {dimension_numbers = #tpu.dot_dimension_numbers<[1], [0], [0], [1], [0, 0, 1, 1], [], []>} : vector<4x256xf32>, vector<256x16xf32>, vector<4x16xf32> -> vector<4x16xf32>
    %cst_43 = arith.constant dense<0.000000e+00> : vector<4x16xf32>
    %63 = tpu.matmul %61, %1, %cst_43 {dimension_numbers = #tpu.dot_dimension_numbers<[1], [0], [0], [1], [0, 0, 1, 1], [], []>} : vector<4x256xf32>, vector<256x16xf32>, vector<4x16xf32> -> vector<4x16xf32>
    %cst_44 = arith.constant dense<0.000000e+00> : vector<8x16xf32>
    %64 = tpu.matmul %2, %62, %cst_44 {dimension_numbers = #tpu.dot_dimension_numbers<[1], [0], [0], [1], [0, 0, 1, 1], [], []>} : vector<8x4xf32>, vector<4x16xf32>, vector<8x16xf32> -> vector<8x16xf32>
    %65 = vector.broadcast %4 : vector<8x1xf32> to vector<8x16xf32>
    %66 = arith.addf %64, %65 : vector<8x16xf32>
    %cst_45 = arith.constant dense<0.000000e+00> : vector<8x16xf32>
    %67 = tpu.matmul %3, %63, %cst_45 {dimension_numbers = #tpu.dot_dimension_numbers<[1], [0], [0], [1], [0, 0, 1, 1], [], []>} : vector<8x4xf32>, vector<4x16xf32>, vector<8x16xf32> -> vector<8x16xf32>
    %68 = vector.broadcast %4 : vector<8x1xf32> to vector<8x16xf32>
    %69 = arith.addf %67, %68 : vector<8x16xf32>
    %cst_46 = arith.constant 3.000000e+00 : f32
    %70 = vector.broadcast %cst_46 : f32 to vector<8x16xf32>
    %71 = arith.addf %66, %70 : vector<8x16xf32>
    %cst_47 = arith.constant 0.000000e+00 : f32
    %cst_48 = arith.constant 6.000000e+00 : f32
    %72 = vector.broadcast %cst_47 : f32 to vector<8x16xf32>
    %73 = arith.maximumf %72, %71 : vector<8x16xf32>
    %74 = vector.broadcast %cst_48 : f32 to vector<8x16xf32>
    %75 = arith.minimumf %74, %73 : vector<8x16xf32>
    %cst_49 = arith.constant 0.166666672 : f32
    %76 = vector.broadcast %cst_49 : f32 to vector<8x16xf32>
    %77 = arith.mulf %75, %76 : vector<8x16xf32>
    %78 = arith.mulf %66, %77 : vector<8x16xf32>
    %cst_50 = arith.constant 3.000000e+00 : f32
    %79 = vector.broadcast %cst_50 : f32 to vector<8x16xf32>
    %80 = arith.addf %69, %79 : vector<8x16xf32>
    %cst_51 = arith.constant 0.000000e+00 : f32
    %cst_52 = arith.constant 6.000000e+00 : f32
    %81 = vector.broadcast %cst_51 : f32 to vector<8x16xf32>
    %82 = arith.maximumf %81, %80 : vector<8x16xf32>
    %83 = vector.broadcast %cst_52 : f32 to vector<8x16xf32>
    %84 = arith.minimumf %83, %82 : vector<8x16xf32>
    %cst_53 = arith.constant 0.166666672 : f32
    %85 = vector.broadcast %cst_53 : f32 to vector<8x16xf32>
    %86 = arith.mulf %84, %85 : vector<8x16xf32>
    %87 = arith.mulf %69, %86 : vector<8x16xf32>
    %cst_54 = arith.constant dense<0.000000e+00> : vector<4x16xf32>
    %88 = tpu.matmul %5, %78, %cst_54 {dimension_numbers = #tpu.dot_dimension_numbers<[1], [0], [0], [1], [0, 0, 1, 1], [], []>} : vector<4x8xf32>, vector<8x16xf32>, vector<4x16xf32> -> vector<4x16xf32>
    %89 = vector.broadcast %6 : vector<4x1xf32> to vector<4x16xf32>
    %90 = arith.addf %88, %89 : vector<4x16xf32>
    %91 = arith.negf %90 : vector<4x16xf32>
    %92 = math.exp %91 : vector<4x16xf32>
    %cst_55 = arith.constant 1.000000e+00 : f32
    %93 = vector.broadcast %cst_55 : f32 to vector<4x16xf32>
    %94 = arith.addf %93, %92 : vector<4x16xf32>
    %95 = arith.divf %93, %94 : vector<4x16xf32>
    %cst_56 = arith.constant dense<0.000000e+00> : vector<4x16xf32>
    %96 = tpu.matmul %7, %87, %cst_56 {dimension_numbers = #tpu.dot_dimension_numbers<[1], [0], [0], [1], [0, 0, 1, 1], [], []>} : vector<4x8xf32>, vector<8x16xf32>, vector<4x16xf32> -> vector<4x16xf32>
    %97 = vector.broadcast %8 : vector<4x1xf32> to vector<4x16xf32>
    %98 = arith.addf %96, %97 : vector<4x16xf32>
    %99 = arith.negf %98 : vector<4x16xf32>
    %100 = math.exp %99 : vector<4x16xf32>
    %cst_57 = arith.constant 1.000000e+00 : f32
    %101 = vector.broadcast %cst_57 : f32 to vector<4x16xf32>
    %102 = arith.addf %101, %100 : vector<4x16xf32>
    %103 = arith.divf %101, %102 : vector<4x16xf32>
    %cst_58 = arith.constant dense<0.000000e+00> : vector<4x256xf32>
    %104 = tpu.matmul %95, %0, %cst_58 {dimension_numbers = #tpu.dot_dimension_numbers<[1], [1], [0], [0], [0, 0, 1, 0], [], []>} : vector<4x16xf32>, vector<256x16xf32>, vector<4x256xf32> -> vector<4x256xf32>
    %cst_59 = arith.constant dense<0.000000e+00> : vector<4x256xf32>
    %105 = tpu.matmul %103, %1, %cst_59 {dimension_numbers = #tpu.dot_dimension_numbers<[1], [1], [0], [0], [0, 0, 1, 0], [], []>} : vector<4x16xf32>, vector<256x16xf32>, vector<4x256xf32> -> vector<4x256xf32>
    %106 = arith.mulf %61, %105 : vector<4x256xf32>
    %107 = arith.mulf %106, %104 : vector<4x256xf32>
    %c1_60 = arith.constant 1 : index
    %c0_61 = arith.constant 0 : index
    %c0_62 = arith.constant 0 : index
    %108 = vector.load %arg11[%c1_60, %c0_61, %c0_62] : memref<2x4x256xf32, #tpu.memory_space<vmem>>, vector<1x4x256xf32>
    %109 = vector.shape_cast %108 : vector<1x4x256xf32> to vector<4x256xf32>
    %110 = vector.shape_cast %107 : vector<4x256xf32> to vector<1x4x256xf32>
    tpu.vector_store %arg11[%c1_60, %c0_61, %c0_62], %110 {strides = array<i32>} : memref<2x4x256xf32, #tpu.memory_space<vmem>>, vector<1x4x256xf32>,
    return
  }
  func.func @transform_0(%arg0: i32) -> (i32, i32, i32) {
    %c0_i32 = arith.constant 0 : i32
    %c0_i32_0 = arith.constant 0 : i32
    %c0_i32_1 = arith.constant 0 : i32
    return %arg0, %c0_i32, %c0_i32_0 : i32, i32, i32
  }
  func.func @transform_1(%arg0: i32) -> (i32, i32) {
    %c0_i32 = arith.constant 0 : i32
    %c0_i32_0 = arith.constant 0 : i32
    %c0_i32_1 = arith.constant 0 : i32
    return %c0_i32, %c0_i32_0 : i32, i32
  }
  func.func @transform_2(%arg0: i32) -> (i32, i32) {
    %c0_i32 = arith.constant 0 : i32
    %c0_i32_0 = arith.constant 0 : i32
    %c0_i32_1 = arith.constant 0 : i32
    return %c0_i32, %c0_i32_0 : i32, i32
  }
  func.func @transform_3(%arg0: i32) -> (i32, i32) {
    %c0_i32 = arith.constant 0 : i32
    %c0_i32_0 = arith.constant 0 : i32
    %c0_i32_1 = arith.constant 0 : i32
    return %c0_i32, %c0_i32_0 : i32, i32
  }
  func.func @transform_4(%arg0: i32) -> (i32, i32) {
    %c0_i32 = arith.constant 0 : i32
    %c0_i32_0 = arith.constant 0 : i32
    %c0_i32_1 = arith.constant 0 : i32
    return %c0_i32, %c0_i32_0 : i32, i32
  }
  func.func @transform_5(%arg0: i32) -> (i32, i32) {
    %c0_i32 = arith.constant 0 : i32
    %c0_i32_0 = arith.constant 0 : i32
    %c0_i32_1 = arith.constant 0 : i32
    return %c0_i32, %c0_i32_0 : i32, i32
  }
  func.func @transform_6(%arg0: i32) -> (i32, i32) {
    %c0_i32 = arith.constant 0 : i32
    %c0_i32_0 = arith.constant 0 : i32
    %c0_i32_1 = arith.constant 0 : i32
    return %c0_i32, %c0_i32_0 : i32, i32
  }
  func.func @transform_7(%arg0: i32) -> (i32, i32) {
    %c0_i32 = arith.constant 0 : i32
    %c0_i32_0 = arith.constant 0 : i32
    %c0_i32_1 = arith.constant 0 : i32
    return %c0_i32, %c0_i32_0 : i32, i32
  }
  func.func @transform_8(%arg0: i32) -> (i32, i32) {
    %c0_i32 = arith.constant 0 : i32
    %c0_i32_0 = arith.constant 0 : i32
    %c0_i32_1 = arith.constant 0 : i32
    return %c0_i32, %c0_i32_0 : i32, i32
  }
  func.func @transform_9(%arg0: i32) -> (i32, i32) {
    %c0_i32 = arith.constant 0 : i32
    %c0_i32_0 = arith.constant 0 : i32
    %c0_i32_1 = arith.constant 0 : i32
    return %c0_i32, %c0_i32_0 : i32, i32
  }
  func.func @transform_10(%arg0: i32) -> (i32, i32, i32) {
    %c0_i32 = arith.constant 0 : i32
    %c0_i32_0 = arith.constant 0 : i32
    %c0_i32_1 = arith.constant 0 : i32
    return %arg0, %c0_i32, %c0_i32_0 : i32, i32, i32
  }
}

module attributes {stable_mosaic.version = 11 : i64} {
  func.func @coordatt_kernel(%arg0: i32, %arg1: memref<2x4x256xf32, #tpu.memory_space<vmem>>, %arg2: memref<256x16xf32, #tpu.memory_space<vmem>>, %arg3: memref<256x16xf32, #tpu.memory_space<vmem>>, %arg4: memref<8x4xf32, #tpu.memory_space<vmem>>, %arg5: memref<8x4xf32, #tpu.memory_space<vmem>>, %arg6: memref<8x1xf32, #tpu.memory_space<vmem>>, %arg7: memref<4x8xf32, #tpu.memory_space<vmem>>, %arg8: memref<4x1xf32, #tpu.memory_space<vmem>>, %arg9: memref<4x8xf32, #tpu.memory_space<vmem>>, %arg10: memref<4x1xf32, #tpu.memory_space<vmem>>, %arg11: memref<2x4x256xf32, #tpu.memory_space<vmem>>) attributes {dimension_semantics = [#tpu.dimension_semantics<parallel>], iteration_bounds = array<i64: 1>, scalar_prefetch = 0 : i64, scratch_operands = 0 : i64, tpu.core_type = #tpu.core_type<tc>, window_params = [{transform_indices = @transform_0, window_bounds = array<i64: 2, 4, 256>}, {pipeline_mode = #tpu.pipeline_mode<synchronous>, transform_indices = @transform_1, window_bounds = array<i64: 256, 16>}, {pipeline_mode = #tpu.pipeline_mode<synchronous>, transform_indices = @transform_2, window_bounds = array<i64: 256, 16>}, {pipeline_mode = #tpu.pipeline_mode<synchronous>, transform_indices = @transform_3, window_bounds = array<i64: 8, 4>}, {pipeline_mode = #tpu.pipeline_mode<synchronous>, transform_indices = @transform_4, window_bounds = array<i64: 8, 4>}, {pipeline_mode = #tpu.pipeline_mode<synchronous>, transform_indices = @transform_5, window_bounds = array<i64: 8, 1>}, {pipeline_mode = #tpu.pipeline_mode<synchronous>, transform_indices = @transform_6, window_bounds = array<i64: 4, 8>}, {pipeline_mode = #tpu.pipeline_mode<synchronous>, transform_indices = @transform_7, window_bounds = array<i64: 4, 1>}, {pipeline_mode = #tpu.pipeline_mode<synchronous>, transform_indices = @transform_8, window_bounds = array<i64: 4, 8>}, {pipeline_mode = #tpu.pipeline_mode<synchronous>, transform_indices = @transform_9, window_bounds = array<i64: 4, 1>}, {transform_indices = @transform_10, window_bounds = array<i64: 2, 4, 256>}]} {
    %c0 = arith.constant 0 : index
    %c0_0 = arith.constant 0 : index
    %0 = vector.load %arg2[%c0, %c0_0] : memref<256x16xf32, #tpu.memory_space<vmem>>, vector<256x16xf32>
    %c0_1 = arith.constant 0 : index
    %c0_2 = arith.constant 0 : index
    %1 = vector.load %arg3[%c0_1, %c0_2] : memref<256x16xf32, #tpu.memory_space<vmem>>, vector<256x16xf32>
    %c0_3 = arith.constant 0 : index
    %c0_4 = arith.constant 0 : index
    %2 = vector.load %arg4[%c0_3, %c0_4] : memref<8x4xf32, #tpu.memory_space<vmem>>, vector<8x4xf32>
    %c0_5 = arith.constant 0 : index
    %c0_6 = arith.constant 0 : index
    %3 = vector.load %arg5[%c0_5, %c0_6] : memref<8x4xf32, #tpu.memory_space<vmem>>, vector<8x4xf32>
    %c0_7 = arith.constant 0 : index
    %c0_8 = arith.constant 0 : index
    %4 = vector.load %arg6[%c0_7, %c0_8] : memref<8x1xf32, #tpu.memory_space<vmem>>, vector<8x1xf32>
    %c0_9 = arith.constant 0 : index
    %c0_10 = arith.constant 0 : index
    %5 = vector.load %arg7[%c0_9, %c0_10] : memref<4x8xf32, #tpu.memory_space<vmem>>, vector<4x8xf32>
    %c0_11 = arith.constant 0 : index
    %c0_12 = arith.constant 0 : index
    %6 = vector.load %arg8[%c0_11, %c0_12] : memref<4x1xf32, #tpu.memory_space<vmem>>, vector<4x1xf32>
    %c0_13 = arith.constant 0 : index
    %c0_14 = arith.constant 0 : index
    %7 = vector.load %arg9[%c0_13, %c0_14] : memref<4x8xf32, #tpu.memory_space<vmem>>, vector<4x8xf32>
    %c0_15 = arith.constant 0 : index
    %c0_16 = arith.constant 0 : index
    %8 = vector.load %arg10[%c0_15, %c0_16] : memref<4x1xf32, #tpu.memory_space<vmem>>, vector<4x1xf32>
    %c0_17 = arith.constant 0 : index
    %c0_18 = arith.constant 0 : index
    %c0_19 = arith.constant 0 : index
    %9 = vector.load %arg1[%c0_17, %c0_18, %c0_19] : memref<2x4x256xf32, #tpu.memory_space<vmem>>, vector<1x4x256xf32>
    %10 = vector.shape_cast %9 : vector<1x4x256xf32> to vector<4x256xf32>
    %cst = arith.constant dense<0.000000e+00> : vector<4x16xf32>
    %11 = tpu.matmul %10, %0, %cst {dimension_numbers = #tpu.dot_dimension_numbers<[1], [0], [0], [1], [0, 0, 1, 1], [], []>} : vector<4x256xf32>, vector<256x16xf32>, vector<4x16xf32> -> vector<4x16xf32>
    %cst_20 = arith.constant dense<0.000000e+00> : vector<4x16xf32>
    %12 = tpu.matmul %10, %1, %cst_20 {dimension_numbers = #tpu.dot_dimension_numbers<[1], [0], [0], [1], [0, 0, 1, 1], [], []>} : vector<4x256xf32>, vector<256x16xf32>, vector<4x16xf32> -> vector<4x16xf32>
    %cst_21 = arith.constant dense<0.000000e+00> : vector<8x16xf32>
    %13 = tpu.matmul %2, %11, %cst_21 {dimension_numbers = #tpu.dot_dimension_numbers<[1], [0], [0], [1], [0, 0, 1, 1], [], []>} : vector<8x4xf32>, vector<4x16xf32>, vector<8x16xf32> -> vector<8x16xf32>
    %14 = vector.broadcast %4 : vector<8x1xf32> to vector<8x16xf32>
    %15 = arith.addf %13, %14 : vector<8x16xf32>
    %cst_22 = arith.constant dense<0.000000e+00> : vector<8x16xf32>
    %16 = tpu.matmul %3, %12, %cst_22 {dimension_numbers = #tpu.dot_dimension_numbers<[1], [0], [0], [1], [0, 0, 1, 1], [], []>} : vector<8x4xf32>, vector<4x16xf32>, vector<8x16xf32> -> vector<8x16xf32>
    %17 = vector.broadcast %4 : vector<8x1xf32> to vector<8x16xf32>
    %18 = arith.addf %16, %17 : vector<8x16xf32>
    %cst_23 = arith.constant 3.000000e+00 : f32
    %19 = vector.broadcast %cst_23 : f32 to vector<8x16xf32>
    %20 = arith.addf %15, %19 : vector<8x16xf32>
    %cst_24 = arith.constant 0.000000e+00 : f32
    %cst_25 = arith.constant 6.000000e+00 : f32
    %21 = vector.broadcast %cst_24 : f32 to vector<8x16xf32>
    %22 = arith.maximumf %21, %20 : vector<8x16xf32>
    %23 = vector.broadcast %cst_25 : f32 to vector<8x16xf32>
    %24 = arith.minimumf %23, %22 : vector<8x16xf32>
    %cst_26 = arith.constant 0.166666672 : f32
    %25 = vector.broadcast %cst_26 : f32 to vector<8x16xf32>
    %26 = arith.mulf %24, %25 : vector<8x16xf32>
    %27 = arith.mulf %15, %26 : vector<8x16xf32>
    %cst_27 = arith.constant 3.000000e+00 : f32
    %28 = vector.broadcast %cst_27 : f32 to vector<8x16xf32>
    %29 = arith.addf %18, %28 : vector<8x16xf32>
    %cst_28 = arith.constant 0.000000e+00 : f32
    %cst_29 = arith.constant 6.000000e+00 : f32
    %30 = vector.broadcast %cst_28 : f32 to vector<8x16xf32>
    %31 = arith.maximumf %30, %29 : vector<8x16xf32>
    %32 = vector.broadcast %cst_29 : f32 to vector<8x16xf32>
    %33 = arith.minimumf %32, %31 : vector<8x16xf32>
    %cst_30 = arith.constant 0.166666672 : f32
    %34 = vector.broadcast %cst_30 : f32 to vector<8x16xf32>
    %35 = arith.mulf %33, %34 : vector<8x16xf32>
    %36 = arith.mulf %18, %35 : vector<8x16xf32>
    %cst_31 = arith.constant dense<0.000000e+00> : vector<4x16xf32>
    %37 = tpu.matmul %5, %27, %cst_31 {dimension_numbers = #tpu.dot_dimension_numbers<[1], [0], [0], [1], [0, 0, 1, 1], [], []>} : vector<4x8xf32>, vector<8x16xf32>, vector<4x16xf32> -> vector<4x16xf32>
    %38 = vector.broadcast %6 : vector<4x1xf32> to vector<4x16xf32>
    %39 = arith.addf %37, %38 : vector<4x16xf32>
    %40 = arith.negf %39 : vector<4x16xf32>
    %41 = math.exp %40 : vector<4x16xf32>
    %cst_32 = arith.constant 1.000000e+00 : f32
    %42 = vector.broadcast %cst_32 : f32 to vector<4x16xf32>
    %43 = arith.addf %42, %41 : vector<4x16xf32>
    %44 = arith.divf %42, %43 : vector<4x16xf32>
    %cst_33 = arith.constant dense<0.000000e+00> : vector<4x16xf32>
    %45 = tpu.matmul %7, %36, %cst_33 {dimension_numbers = #tpu.dot_dimension_numbers<[1], [0], [0], [1], [0, 0, 1, 1], [], []>} : vector<4x8xf32>, vector<8x16xf32>, vector<4x16xf32> -> vector<4x16xf32>
    %46 = vector.broadcast %8 : vector<4x1xf32> to vector<4x16xf32>
    %47 = arith.addf %45, %46 : vector<4x16xf32>
    %48 = arith.negf %47 : vector<4x16xf32>
    %49 = math.exp %48 : vector<4x16xf32>
    %cst_34 = arith.constant 1.000000e+00 : f32
    %50 = vector.broadcast %cst_34 : f32 to vector<4x16xf32>
    %51 = arith.addf %50, %49 : vector<4x16xf32>
    %52 = arith.divf %50, %51 : vector<4x16xf32>
    %cst_35 = arith.constant dense<0.000000e+00> : vector<4x256xf32>
    %53 = tpu.matmul %44, %0, %cst_35 {dimension_numbers = #tpu.dot_dimension_numbers<[1], [1], [0], [0], [0, 0, 1, 0], [], []>} : vector<4x16xf32>, vector<256x16xf32>, vector<4x256xf32> -> vector<4x256xf32>
    %cst_36 = arith.constant dense<0.000000e+00> : vector<4x256xf32>
    %54 = tpu.matmul %52, %1, %cst_36 {dimension_numbers = #tpu.dot_dimension_numbers<[1], [1], [0], [0], [0, 0, 1, 0], [], []>} : vector<4x16xf32>, vector<256x16xf32>, vector<4x256xf32> -> vector<4x256xf32>
    %55 = arith.mulf %10, %54 : vector<4x256xf32>
    %56 = arith.mulf %55, %53 : vector<4x256xf32>
    %c0_37 = arith.constant 0 : index
    %c0_38 = arith.constant 0 : index
    %c0_39 = arith.constant 0 : index
    %57 = vector.load %arg11[%c0_37, %c0_38, %c0_39] : memref<2x4x256xf32, #tpu.memory_space<vmem>>, vector<1x4x256xf32>
    %58 = vector.shape_cast %57 : vector<1x4x256xf32> to vector<4x256xf32>
    %59 = vector.shape_cast %56 : vector<4x256xf32> to vector<1x4x256xf32>
    tpu.vector_store %arg11[%c0_37, %c0_38, %c0_39], %59 {strides = array<i32>} : memref<2x4x256xf32, #tpu.memory_space<vmem>>, vector<1x4x256xf32>,
    %c1 = arith.constant 1 : index
    %c0_40 = arith.constant 0 : index
    %c0_41 = arith.constant 0 : index
    %60 = vector.load %arg1[%c1, %c0_40, %c0_41] : memref<2x4x256xf32, #tpu.memory_space<vmem>>, vector<1x4x256xf32>
    %61 = vector.shape_cast %60 : vector<1x4x256xf32> to vector<4x256xf32>
    %cst_42 = arith.constant dense<0.000000e+00> : vector<4x16xf32>
    %62 = tpu.matmul %61, %0, %cst_42 {dimension_numbers = #tpu.dot_dimension_numbers<[1], [0], [0], [1], [0, 0, 1, 1], [], []>} : vector<4x256xf32>, vector<256x16xf32>, vector<4x16xf32> -> vector<4x16xf32>
    %cst_43 = arith.constant dense<0.000000e+00> : vector<4x16xf32>
    %63 = tpu.matmul %61, %1, %cst_43 {dimension_numbers = #tpu.dot_dimension_numbers<[1], [0], [0], [1], [0, 0, 1, 1], [], []>} : vector<4x256xf32>, vector<256x16xf32>, vector<4x16xf32> -> vector<4x16xf32>
    %cst_44 = arith.constant dense<0.000000e+00> : vector<8x16xf32>
    %64 = tpu.matmul %2, %62, %cst_44 {dimension_numbers = #tpu.dot_dimension_numbers<[1], [0], [0], [1], [0, 0, 1, 1], [], []>} : vector<8x4xf32>, vector<4x16xf32>, vector<8x16xf32> -> vector<8x16xf32>
    %65 = vector.broadcast %4 : vector<8x1xf32> to vector<8x16xf32>
    %66 = arith.addf %64, %65 : vector<8x16xf32>
    %cst_45 = arith.constant dense<0.000000e+00> : vector<8x16xf32>
    %67 = tpu.matmul %3, %63, %cst_45 {dimension_numbers = #tpu.dot_dimension_numbers<[1], [0], [0], [1], [0, 0, 1, 1], [], []>} : vector<8x4xf32>, vector<4x16xf32>, vector<8x16xf32> -> vector<8x16xf32>
    %68 = vector.broadcast %4 : vector<8x1xf32> to vector<8x16xf32>
    %69 = arith.addf %67, %68 : vector<8x16xf32>
    %cst_46 = arith.constant 3.000000e+00 : f32
    %70 = vector.broadcast %cst_46 : f32 to vector<8x16xf32>
    %71 = arith.addf %66, %70 : vector<8x16xf32>
    %cst_47 = arith.constant 0.000000e+00 : f32
    %cst_48 = arith.constant 6.000000e+00 : f32
    %72 = vector.broadcast %cst_47 : f32 to vector<8x16xf32>
    %73 = arith.maximumf %72, %71 : vector<8x16xf32>
    %74 = vector.broadcast %cst_48 : f32 to vector<8x16xf32>
    %75 = arith.minimumf %74, %73 : vector<8x16xf32>
    %cst_49 = arith.constant 0.166666672 : f32
    %76 = vector.broadcast %cst_49 : f32 to vector<8x16xf32>
    %77 = arith.mulf %75, %76 : vector<8x16xf32>
    %78 = arith.mulf %66, %77 : vector<8x16xf32>
    %cst_50 = arith.constant 3.000000e+00 : f32
    %79 = vector.broadcast %cst_50 : f32 to vector<8x16xf32>
    %80 = arith.addf %69, %79 : vector<8x16xf32>
    %cst_51 = arith.constant 0.000000e+00 : f32
    %cst_52 = arith.constant 6.000000e+00 : f32
    %81 = vector.broadcast %cst_51 : f32 to vector<8x16xf32>
    %82 = arith.maximumf %81, %80 : vector<8x16xf32>
    %83 = vector.broadcast %cst_52 : f32 to vector<8x16xf32>
    %84 = arith.minimumf %83, %82 : vector<8x16xf32>
    %cst_53 = arith.constant 0.166666672 : f32
    %85 = vector.broadcast %cst_53 : f32 to vector<8x16xf32>
    %86 = arith.mulf %84, %85 : vector<8x16xf32>
    %87 = arith.mulf %69, %86 : vector<8x16xf32>
    %cst_54 = arith.constant dense<0.000000e+00> : vector<4x16xf32>
    %88 = tpu.matmul %5, %78, %cst_54 {dimension_numbers = #tpu.dot_dimension_numbers<[1], [0], [0], [1], [0, 0, 1, 1], [], []>} : vector<4x8xf32>, vector<8x16xf32>, vector<4x16xf32> -> vector<4x16xf32>
    %89 = vector.broadcast %6 : vector<4x1xf32> to vector<4x16xf32>
    %90 = arith.addf %88, %89 : vector<4x16xf32>
    %91 = arith.negf %90 : vector<4x16xf32>
    %92 = math.exp %91 : vector<4x16xf32>
    %cst_55 = arith.constant 1.000000e+00 : f32
    %93 = vector.broadcast %cst_55 : f32 to vector<4x16xf32>
    %94 = arith.addf %93, %92 : vector<4x16xf32>
    %95 = arith.divf %93, %94 : vector<4x16xf32>
    %cst_56 = arith.constant dense<0.000000e+00> : vector<4x16xf32>
    %96 = tpu.matmul %7, %87, %cst_56 {dimension_numbers = #tpu.dot_dimension_numbers<[1], [0], [0], [1], [0, 0, 1, 1], [], []>} : vector<4x8xf32>, vector<8x16xf32>, vector<4x16xf32> -> vector<4x16xf32>
    %97 = vector.broadcast %8 : vector<4x1xf32> to vector<4x16xf32>
    %98 = arith.addf %96, %97 : vector<4x16xf32>
    %99 = arith.negf %98 : vector<4x16xf32>
    %100 = math.exp %99 : vector<4x16xf32>
    %cst_57 = arith.constant 1.000000e+00 : f32
    %101 = vector.broadcast %cst_57 : f32 to vector<4x16xf32>
    %102 = arith.addf %101, %100 : vector<4x16xf32>
    %103 = arith.divf %101, %102 : vector<4x16xf32>
    %cst_58 = arith.constant dense<0.000000e+00> : vector<4x256xf32>
    %104 = tpu.matmul %95, %0, %cst_58 {dimension_numbers = #tpu.dot_dimension_numbers<[1], [1], [0], [0], [0, 0, 1, 0], [], []>} : vector<4x16xf32>, vector<256x16xf32>, vector<4x256xf32> -> vector<4x256xf32>
    %cst_59 = arith.constant dense<0.000000e+00> : vector<4x256xf32>
    %105 = tpu.matmul %103, %1, %cst_59 {dimension_numbers = #tpu.dot_dimension_numbers<[1], [1], [0], [0], [0, 0, 1, 0], [], []>} : vector<4x16xf32>, vector<256x16xf32>, vector<4x256xf32> -> vector<4x256xf32>
    %106 = arith.mulf %61, %105 : vector<4x256xf32>
    %107 = arith.mulf %106, %104 : vector<4x256xf32>
    %c1_60 = arith.constant 1 : index
    %c0_61 = arith.constant 0 : index
    %c0_62 = arith.constant 0 : index
    %108 = vector.load %arg11[%c1_60, %c0_61, %c0_62] : memref<2x4x256xf32, #tpu.memory_space<vmem>>, vector<1x4x256xf32>
    %109 = vector.shape_cast %108 : vector<1x4x256xf32> to vector<4x256xf32>
    %110 = vector.shape_cast %107 : vector<4x256xf32> to vector<1x4x256xf32>
    tpu.vector_store %arg11[%c1_60, %c0_61, %c0_62], %110 {strides = array<i32>} : memref<2x4x256xf32, #tpu.memory_space<vmem>>, vector<1x4x256xf32>,
    return
  }
  func.func @transform_0(%arg0: i32) -> (i32, i32, i32) {
    %c0_i32 = arith.constant 0 : i32
    %c0_i32_0 = arith.constant 0 : i32
    %c0_i32_1 = arith.constant 0 : i32
    return %arg0, %c0_i32, %c0_i32_0 : i32, i32, i32
  }
  func.func @transform_1(%arg0: i32) -> (i32, i32) {
    %c0_i32 = arith.constant 0 : i32
    %c0_i32_0 = arith.constant 0 : i32
    %c0_i32_1 = arith.constant 0 : i32
    return %c0_i32, %c0_i32_0 : i32, i32
  }
  func.func @transform_2(%arg0: i32) -> (i32, i32) {
    %c0_i32 = arith.constant 0 : i32
    %c0_i32_0 = arith.constant 0 : i32
    %c0_i32_1 = arith.constant 0 : i32
    return %c0_i32, %c0_i32_0 : i32, i32
  }
  func.func @transform_3(%arg0: i32) -> (i32, i32) {
    %c0_i32 = arith.constant 0 : i32
    %c0_i32_0 = arith.constant 0 : i32
    %c0_i32_1 = arith.constant 0 : i32
    return %c0_i32, %c0_i32_0 : i32, i32
  }
  func.func @transform_4(%arg0: i32) -> (i32, i32) {
    %c0_i32 = arith.constant 0 : i32
    %c0_i32_0 = arith.constant 0 : i32
    %c0_i32_1 = arith.constant 0 : i32
    return %c0_i32, %c0_i32_0 : i32, i32
  }
  func.func @transform_5(%arg0: i32) -> (i32, i32) {
    %c0_i32 = arith.constant 0 : i32
    %c0_i32_0 = arith.constant 0 : i32
    %c0_i32_1 = arith.constant 0 : i32
    return %c0_i32, %c0_i32_0 : i32, i32
  }
  func.func @transform_6(%arg0: i32) -> (i32, i32) {
    %c0_i32 = arith.constant 0 : i32
    %c0_i32_0 = arith.constant 0 : i32
    %c0_i32_1 = arith.constant 0 : i32
    return %c0_i32, %c0_i32_0 : i32, i32
  }
  func.func @transform_7(%arg0: i32) -> (i32, i32) {
    %c0_i32 = arith.constant 0 : i32
    %c0_i32_0 = arith.constant 0 : i32
    %c0_i32_1 = arith.constant 0 : i32
    return %c0_i32, %c0_i32_0 : i32, i32
  }
  func.func @transform_8(%arg0: i32) -> (i32, i32) {
    %c0_i32 = arith.constant 0 : i32
    %c0_i32_0 = arith.constant 0 : i32
    %c0_i32_1 = arith.constant 0 : i32
    return %c0_i32, %c0_i32_0 : i32, i32
  }
  func.func @transform_9(%arg0: i32) -> (i32, i32) {
    %c0_i32 = arith.constant 0 : i32
    %c0_i32_0 = arith.constant 0 : i32
    %c0_i32_1 = arith.constant 0 : i32
    return %c0_i32, %c0_i32_0 : i32, i32
  }
  func.func @transform_10(%arg0: i32) -> (i32, i32, i32) {
    %c0_i32 = arith.constant 0 : i32
    %c0_i32_0 = arith.constant 0 : i32
    %c0_i32_1 = arith.constant 0 : i32
    return %arg0, %c0_i32, %c0_i32_0 : i32, i32, i32
  }
}

</mosaic_0001>

<bundles_post_ra>
// kernel: tpu_custom_call.1
= control target key start
LH: loop header
LB: loop body
LE: loop exit
PB: predicated region body
PF: predicated region fallthrough
CT: control target
= control target key end

     0   :  { %s3127_s0 = inlined_call_operand.vmem [shape: f32[2,4,256], index: 0, kind: input, shape index: {}]   ;;  %s3128_s1 = inlined_call_operand.vmem [shape: f32[256,16], index: 1, kind: input, shape index: {}]   ;;  %s3129_s2 = inlined_call_operand.vmem [shape: f32[256,16], index: 2, kind: input, shape index: {}]   ;;  %s3130_s3 = inlined_call_operand.vmem [shape: f32[8,4], index: 3, kind: input, shape index: {}]   ;;  %s3131_s4 = inlined_call_operand.vmem [shape: f32[8,4], index: 4, kind: input, shape index: {}]   ;;  %s3132_s5 = inlined_call_operand.vmem [shape: f32[8,1], index: 5, kind: input, shape index: {}]   ;;  %s3133_s6 = inlined_call_operand.vmem [shape: f32[4,8], index: 6, kind: input, shape index: {}]   ;;  %s3134_s7 = inlined_call_operand.vmem [shape: f32[4,1], index: 7, kind: input, shape index: {}]   ;;  %s3135_s8 = inlined_call_operand.vmem [shape: f32[4,8], index: 8, kind: input, shape index: {}]   ;;  %s3136_s9 = inlined_call_operand.vmem [shape: f32[4,1], index: 9, kind: input, shape index: {}]   ;;  %s3137_s10 = inlined_call_operand.hbm [shape: f32[2,4,256], index: 10, kind: output, shape index: {}]  }
   0x1   :  { %v52_v0 = vld [vmem:[%s3128_s1 + $0x80] sm:$0xff]  ;;  %v53_v1 = vld [vmem:[%s3128_s1 + $0x88] sm:$0xff]  ;;  %v54_v11 = vld [vmem:[%s3128_s1 + $0x90] sm:$0xff] }
   0x2   :  { %v84_v2 = vld [vmem:[%s3129_s2 + $0x80] sm:$0xff]  ;;  %v2491_v3 = vpack.c.bf16 %v53_v1, %v52_v0  ;;  %v85_v4 = vld [vmem:[%s3129_s2 + $0x88] sm:$0xff]  ;;  %v55_v13 = vld [vmem:[%s3128_s1 + $0x98] sm:$0xff] }
   0x3   :  { %v36_v5 = vld [vmem:[%s3128_s1] sm:$0xff]  ;;  %v37_v6 = vld [vmem:[%s3128_s1 + $0x8] sm:$0xff]  ;;  %v2502_v7 = vpack.c.bf16 %v85_v4, %v84_v2  ;;  %v86_v14 = vld [vmem:[%s3129_s2 + $0x90] sm:$0xff]  ;;  %v2529_v16 = vpack.c.bf16 %v55_v13, %v54_v11 }
   0x4   :  { %v2504_v8 = vpack.c.bf16 %v37_v6, %v36_v5  ;;  %v68_v9 = vld [vmem:[%s3129_s2] sm:$0xff]  ;;  %v69_v10 = vld [vmem:[%s3129_s2 + $0x8] sm:$0xff]  ;;  %2052 = vmatprep.subr.bf16.mxu0 %v2491_v3  ;;  %v87_v15 = vld [vmem:[%s3129_s2 + $0x98] sm:$0xff] }
   0x5   :  { %v2516_v12 = vpack.c.bf16 %v69_v10, %v68_v9  ;;  %2084 = vmatprep.subr.bf16.mxu1 %v2502_v7  ;;  %v2531_v17 = vpack.c.bf16 %v87_v15, %v86_v14  ;;  %v38_v18 = vld [vmem:[%s3128_s1 + $0x10] sm:$0xff]  ;;  %v39_v19 = vld [vmem:[%s3128_s1 + $0x18] sm:$0xff]  ;;  %v56_v23 = vld [vmem:[%s3128_s1 + $0xa0] sm:$0xff] }
   0x6   :  { %2054 = vmatpush3.bf16.msra.mxu0 %v2504_v8  ;;  %v70_v20 = vld [vmem:[%s3129_s2 + $0x10] sm:$0xff]  ;;  %v2543_v21 = vpack.c.bf16 %v39_v19, %v38_v18  ;;  %v71_v22 = vld [vmem:[%s3129_s2 + $0x18] sm:$0xff]  ;;  %v57_v24 = vld [vmem:[%s3128_s1 + $0xa8] sm:$0xff] }
   0x7   :  { %2086 = vmatpush3.bf16.msra.mxu1 %v2516_v12  ;;  %2056 = vmatprep.subr.bf16.mxu0 %v2529_v16  ;;  %v2556_v25 = vpack.c.bf16 %v71_v22, %v70_v20  ;;  %v2558_v26 = vpack.c.bf16 %v57_v24, %v56_v23  ;;  %v88_v27 = vld [vmem:[%s3129_s2 + $0xa0] sm:$0xff]  ;;  %v89_v28 = vld [vmem:[%s3129_s2 + $0xa8] sm:$0xff]  ;;  %v58_v35 = vld [vmem:[%s3128_s1 + $0xb0] sm:$0xff] }
   0x8   :  { %2088 = vmatprep.subr.bf16.mxu1 %v2531_v17  ;;  %v40_v29 = vld [vmem:[%s3128_s1 + $0x20] sm:$0xff]  ;;  %v2569_v30 = vpack.c.bf16 %v89_v28, %v88_v27  ;;  %v41_v31 = vld [vmem:[%s3128_s1 + $0x28] sm:$0xff]  ;;  %v59_v36 = vld [vmem:[%s3128_s1 + $0xb8] sm:$0xff] }
   0x9   :  { %v72_v32 = vld [vmem:[%s3129_s2 + $0x20] sm:$0xff]  ;;  %v73_v33 = vld [vmem:[%s3129_s2 + $0x28] sm:$0xff]  ;;  %v2581_v34 = vpack.c.bf16 %v41_v31, %v40_v29  ;;  %v90_v37 = vld [vmem:[%s3129_s2 + $0xb0] sm:$0xff]  ;;  %v2596_v39 = vpack.c.bf16 %v59_v36, %v58_v35 }
   0xa   :  { %2058 = vmatpush3.bf16.msra.mxu0 %v2543_v21  ;;  %v2594_v38 = vpack.c.bf16 %v73_v33, %v72_v32  ;;  %v91_v40 = vld [vmem:[%s3129_s2 + $0xb8] sm:$0xff]  ;;  %v42_v41 = vld [vmem:[%s3128_s1 + $0x30] sm:$0xff]  ;;  %v60_v46 = vld [vmem:[%s3128_s1 + $0xc0] sm:$0xff] }
   0xb   :  { %2090 = vmatpush3.bf16.msra.mxu1 %v2556_v25  ;;  %2060 = vmatprep.subr.bf16.mxu0 %v2558_v26  ;;  %v43_v42 = vld [vmem:[%s3128_s1 + $0x38] sm:$0xff]  ;;  %v2608_v43 = vpack.c.bf16 %v91_v40, %v90_v37  ;;  %v74_v44 = vld [vmem:[%s3129_s2 + $0x30] sm:$0xff]  ;;  %v61_v47 = vld [vmem:[%s3128_s1 + $0xc8] sm:$0xff] }
   0xc   :  { %2092 = vmatprep.subr.bf16.mxu1 %v2569_v30  ;;  %v75_v45 = vld [vmem:[%s3129_s2 + $0x38] sm:$0xff]  ;;  %v92_v48 = vld [vmem:[%s3129_s2 + $0xc0] sm:$0xff]  ;;  %v93_v49 = vld [vmem:[%s3129_s2 + $0xc8] sm:$0xff]  ;;  %v2629_v50 = vpack.c.bf16 %v43_v42, %v42_v41  ;;  %v2635_v52 = vpack.c.bf16 %v61_v47, %v60_v46 }
   0xd   :  { %v2633_v51 = vpack.c.bf16 %v75_v45, %v74_v44  ;;  %v44_v53 = vld [vmem:[%s3128_s1 + $0x40] sm:$0xff]  ;;  %v45_v54 = vld [vmem:[%s3128_s1 + $0x48] sm:$0xff]  ;;  %v2647_v56 = vpack.c.bf16 %v93_v49, %v92_v48  ;;  %v62_v58 = vld [vmem:[%s3128_s1 + $0xd0] sm:$0xff] }
   0xe   :  { %2062 = vmatpush3.bf16.msra.mxu0 %v2581_v34  ;;  %v76_v55 = vld [vmem:[%s3129_s2 + $0x40] sm:$0xff]  ;;  %v77_v57 = vld [vmem:[%s3129_s2 + $0x48] sm:$0xff]  ;;  %v63_v59 = vld [vmem:[%s3128_s1 + $0xd8] sm:$0xff]  ;;  %v2665_v62 = vpack.c.bf16 %v45_v54, %v44_v53 }
   0xf   :  { %2094 = vmatpush3.bf16.msra.mxu1 %v2594_v38  ;;  %2064 = vmatprep.subr.bf16.mxu0 %v2596_v39  ;;  %v94_v60 = vld [vmem:[%s3129_s2 + $0xd0] sm:$0xff]  ;;  %v95_v61 = vld [vmem:[%s3129_s2 + $0xd8] sm:$0xff]  ;;  %v2669_v63 = vpack.c.bf16 %v77_v57, %v76_v55  ;;  %v2671_v0 = vpack.c.bf16 %v63_v59, %v62_v58  ;;  %v64_v9 = vld [vmem:[%s3128_s1 + $0xe0] sm:$0xff] }
  0x10   :  { %2096 = vmatprep.subr.bf16.mxu1 %v2608_v43  ;;  %v46_v1 = vld [vmem:[%s3128_s1 + $0x50] sm:$0xff]  ;;  %v47_v2 = vld [vmem:[%s3128_s1 + $0x58] sm:$0xff]  ;;  %v2683_v5 = vpack.c.bf16 %v95_v61, %v94_v60  ;;  %v65_v10 = vld [vmem:[%s3128_s1 + $0xe8] sm:$0xff] }
  0x11   :  { %v78_v4 = vld [vmem:[%s3129_s2 + $0x50] sm:$0xff]  ;;  %v79_v6 = vld [vmem:[%s3129_s2 + $0x58] sm:$0xff]  ;;  %v96_v11 = vld [vmem:[%s3129_s2 + $0xe0] sm:$0xff]  ;;  %v2701_v14 = vpack.c.bf16 %v47_v2, %v46_v1  ;;  %v2713_v20 = vpack.c.bf16 %v65_v10, %v64_v9 }
  0x12   :  { %2066 = vmatpush3.bf16.msra.mxu0 %v2629_v50  ;;  %v97_v13 = vld [vmem:[%s3129_s2 + $0xe8] sm:$0xff]  ;;  %v48_v15 = vld [vmem:[%s3128_s1 + $0x60] sm:$0xff]  ;;  %v2711_v19 = vpack.c.bf16 %v79_v6, %v78_v4 }
  0x13   :  { %2098 = vmatpush3.bf16.msra.mxu1 %v2633_v51  ;;  %2068 = vmatprep.subr.bf16.mxu0 %v2635_v52  ;;  %v49_v18 = vld [vmem:[%s3128_s1 + $0x68] sm:$0xff]  ;;  %v80_v22 = vld [vmem:[%s3129_s2 + $0x60] sm:$0xff] }
  0x14   :  { %2100 = vmatprep.subr.bf16.mxu1 %v2647_v56  ;;  %v2721_v23 = vld [vmem:[%s3127_s0] sm:$0xff] }
  0x16   :  { %2070 = vmatpush3.bf16.msra.mxu0 %v2665_v62 }
  0x17   :  { %2102 = vmatpush3.bf16.msra.mxu1 %v2669_v63  ;;  %2072 = vmatprep.subr.bf16.mxu0 %v2671_v0 }
  0x18   :  { %15 = vsyncpa [#allocation3], 0  ;;  %2104 = vmatprep.subr.bf16.mxu1 %v2683_v5  ;;  %v2724_v24 = vpack.c.bf16 %v97_v13, %v96_v11  ;;  %v81_v27 = vld [vmem:[%s3129_s2 + $0x68] sm:$0xff]  ;;  %v66_v28 = vld [vmem:[%s3128_s1 + $0xf0] sm:$0xff]  ;;  %v109_v31 = vcombine.high %v2721_v23, %v2721_v23  ;;  %v2744_v35 = vpack.c.bf16 %v49_v18, %v48_v15  ;;  %v2421_v48 = vmov 0.0  }
  0x19   :  { %v67_v29 = vld [vmem:[%s3128_s1 + $0xf8] sm:$0xff]  ;;  %v98_v32 = vld [vmem:[%s3129_s2 + $0xf0] sm:$0xff]  ;;  %v2748_v36 = vpack.c.bf16 %v81_v27, %v80_v22  ;;  %vm2422_vm0 = vmmov 0   ;;  %v102_v49 = vld [vmem:[%s3132_s5] sm:$0xff]  ;;  %v2423_v53 = vmov 0   ;;  %vm260_vm1 = vcmask 1043456  }
  0x1a   :  { %v99_v33 = vld [vmem:[%s3129_s2 + $0xf8] sm:$0xff]  ;;  %2074 = vmatpush3.bf16.msra.mxu0 %v2701_v14  ;;  %175 = vmatprep.mubr.f32.mxu0 %v109_v31  ;;  %v2750_v37 = vpack.c.bf16 %v67_v29, %v66_v28  ;;  %v50_v40 = vld [vmem:[%s3128_s1 + $0x70] sm:$0xff]  ;;  %v106_v54 = vld [vmem:[%s3136_s9] sm:$0xf]  ;;  %vm256_vm2 = vcmask 31744   ;;  %vm589_vm3 = vcmask 130048  }
  0x1b   :  { %2106 = vmatpush3.bf16.msra.mxu1 %v2711_v19  ;;  %2076 = vmatprep.subr.bf16.mxu0 %v2713_v20  ;;  %v51_v41 = vld [vmem:[%s3128_s1 + $0x78] sm:$0xff]  ;;  %v2759_v42 = vpack.c.bf16 %v99_v33, %v98_v32  ;;  %v82_v44 = vld [vmem:[%s3129_s2 + $0x70] sm:$0xff]  ;;  %v2794_v61 = vld [vmem:[%s3130_s3] sm:$0xff]  ;;  %vm425_vm4 = vcmask 64512  }
  0x1c   :  { %2108 = vmatprep.subr.bf16.mxu1 %v2724_v24  ;;  %v83_v45 = vld [vmem:[%s3129_s2 + $0x78] sm:$0xff]  ;;  %245 = vmatprep.mubr.f32.mxu1 %v109_v31  ;;  %v2768_v46 = vpack.c.bf16 %v51_v41, %v50_v40  ;;  %v2799_v2 = vld [vmem:[%s3131_s4] sm:$0xff]  ;;  %vm2832_vm5 = vmpackc.low %vm589_vm3, %vm589_vm3 }
  0x1d   :  { %v2772_v47 = vpack.c.bf16 %v83_v45, %v82_v44  ;;  %2377 = vset.pattern.permute.xlu0 %v2423_v53  ;;  %2378 = vset.pattern.permute.xlu1 %v2423_v53  ;;  %v104_v4 = vld [vmem:[%s3134_s7] sm:$0xf] }
  0x1e   :  { %2078 = vmatpush3.bf16.msra.mxu0 %v2744_v35  ;;  %253 = vperm.xlu0 %2377, %v102_v49   ;;  %v2823_v44 = vld [vmem:[%s3133_s6] sm:$0xf] }
  0x1f   :  { %2110 = vmatpush3.bf16.msra.mxu1 %v2748_v36  ;;  %2080 = vmatprep.subr.bf16.mxu0 %v2750_v37  ;;  %v2828_v49 = vld [vmem:[%s3135_s8] sm:$0xf] }
  0x20   :  { %2112 = vmatprep.subr.bf16.mxu1 %v2759_v42  ;;  %422 = vperm.xlu1 %2378, %v104_v4  }
  0x22   :  { %2082 = vmatpush3.bf16.msra.mxu0 %v2768_v46  ;;  %507 = vperm.xlu0 %2377, %v106_v54  }
  0x23   :  { %2114 = vmatpush3.bf16.msra.mxu1 %v2772_v47  ;;  %2011 = vmatprep.subr.mxu0 %v2421_v48 }
  0x24   :  { %2016 = vmatprep.subr.mxu1 %v2421_v48 }
  0x25   :  { %176 = vmatmul.mubr.f32.vlgmr.msra.gmra.mrb[0].mxu0 %v2721_v23 }
  0x26   :  { %246 = vmatmul.mubr.f32.vlgmr.msra.gmra.mrb[0].mxu1 %v2721_v23  ;;  %2013 = vmatprep.mubr.msk.f32.mxu0 %vm2422_vm0, %v2421_v48 }
  0x27   :  { %2018 = vmatprep.mubr.msk.f32.mxu1 %vm2422_vm0, %v2421_v48 }
  0x9d   :  { %v2816_v6 = vpop.permute.xlu0 %253 }
  0x9f   :  { %v2938_v54 = vpop.permute.xlu1 %422 }
  0xf8   :  { %v1751_v55 = vpop.f32.mrb[0].mxu0 }
  0xf9   :  { %v1786_v57 = vpop.f32.mrb[0].mxu1  ;;  %v1752_v58 = vpop.f32.mrb[1].mxu0 }
  0xfa   :  { %v1753_v59 = vadd.f32 %v1752_v58, %v1751_v55  ;;  %v1787_v60 = vpop.f32.mrb[1].mxu1  ;;  %v2940_v55 = vpop.permute.xlu0 %507 }
  0xfb   :  { %v1788_v1 = vadd.f32 %v1787_v60, %v1786_v57 }
  0xfc   :  { %2012 = vmatpush3.msk.msra.mxu0 %vm260_vm1, %v1753_v59 }
  0xfd   :  { %2017 = vmatpush3.msk.msra.mxu1 %vm260_vm1, %v1788_v1  ;;  %2014 = vmatmul.mubr.msk.f32.vlgmr.msra.gmra.mrb[2].mxu0 %vm256_vm2, %v2794_v61 }
  0xfe   :  { %2019 = vmatmul.mubr.msk.f32.vlgmr.msra.gmra.mrb[2].mxu1 %vm256_vm2, %v2799_v2  ;;  %2021 = vmatprep.subr.mxu0 %v2421_v48 }
  0xff   :  { %2026 = vmatprep.subr.mxu1 %v2421_v48  ;;  %2023 = vmatprep.mubr.msk.f32.mxu0 %vm2422_vm0, %v2421_v48 }
 0x100   :  { %2028 = vmatprep.mubr.msk.f32.mxu1 %vm2422_vm0, %v2421_v48 }
 0x1d0   :  { %v330_v9 = vpop.f32.mrb[2].mxu0 }
 0x1d1   :  { %v331_v10 = vadd.f32 %v330_v9, %v2816_v6  ;;  %v406_v11 = vpop.f32.mrb[2].mxu1  ;;  %v2015_v13 = vpop.f32.mrb[3].mxu0 }
 0x1d2   :  { %v407_v15 = vadd.f32 %v406_v11, %v2816_v6  ;;  %v2020_v18 = vpop.f32.mrb[3].mxu1 }
 0x1d3   :  { %v410_v22 = vadd.f32 3.0, %v331_v10 }
 0x1d4   :  { %v415_v27 = vadd.f32 3.0, %v407_v15 }
 0x1d5   :  { %v411_v28 = vmax.f32 %v410_v22, 0.0  ;;  %v2947_v22 = vld [vmem:[%s3127_s0 + $0x8] sm:$0xff]  ;;  %s2424_s0 = smov [#allocation2]  }
 0x1d6   :  { %v416_v29 = vmax.f32 %v415_v27, 0.0  ;;  %s1559_s30 = sshll.u32 %s2424_s0, 4  ;;  %s1560_s30 = int_to_ptr.vmem [resolvable:$true] %s1559_s30 }
 0x1d7   :  { %v412_v31 = vmin.f32 %v411_v28, 6.0  ;;  %s2397_s11 = scalar_lea.vmem %s1560_s30, 256  ;;  %p2402_p1 = scmp.lt.s32.totalorder %s1560_s30, %s1560_s30 }
 0x1d8   :  { %v417_v32 = vmin.f32 %v416_v29, 6.0  ;;  %v944_v29 = vcombine.high %v2947_v22, %v2947_v22  ;;  %p2398_p0 = scmp.ne.s32.totalorder %s1560_s30, %s2397_s11  ;;  %p2403_p2 = scmp.lt.s32.totalorder %s2397_s11, %s2397_s11 }
 0x1d9   :  { %v413_v33 = vmul.f32 0.16666667, %v412_v31 }
 0x1da   :  { %v418_v40 = vmul.f32 0.16666667, %v417_v32  ;;  %p2404_p3 = por %p2403_p2, %p2402_p1 }
 0x1db   :  { %v414_v41 = vmul.f32 %v413_v33, %v331_v10 }
 0x1dc   :  { %v419_v45 = vmul.f32 %v418_v40, %v407_v15  ;;  %p2405_p4 = pnand %p2404_p3, %p2398_p0 }
 0x1dd   :  { %2022 = vmatpush3.msra.mxu0 %v414_v41 }
 0x1de   :  { %2027 = vmatpush3.msra.mxu1 %v419_v45  ;;  %2024 = vmatmul.mubr.msk.f32.vlgmr.msra.gmra.mrb[4].mxu0 %vm425_vm4, %v2823_v44 }
 0x1df   :  { %2029 = vmatmul.mubr.msk.f32.vlgmr.msra.gmra.mrb[4].mxu1 %vm425_vm4, %v2828_v49  ;;  %2117 = vmatprep.subr.msk.bf16.mxu0 %vm2832_vm5, %v2491_v3 }
 0x1e0   :  { %2165 = vmatprep.subr.msk.bf16.mxu1 %vm2832_vm5, %v2502_v7 }
 0x1e4   :  { %2120 = vmatpush3.bf16.xpose.msk.msra.mxu0 %vm2832_vm5, %v2504_v8 }
 0x1e5   :  { %2168 = vmatpush3.bf16.xpose.msk.msra.mxu1 %vm2832_vm5, %v2516_v12  ;;  %2123 = vmatprep.subr.msk.bf16.mxu0 %vm2832_vm5, %v2529_v16 }
 0x1e6   :  { %2171 = vmatprep.subr.msk.bf16.mxu1 %vm2832_vm5, %v2531_v17 }
 0x1ec   :  { %2126 = vmatpush3.bf16.xpose.msk.msra.mxu0 %vm2832_vm5, %v2543_v21 }
 0x1ed   :  { %2174 = vmatpush3.bf16.xpose.msk.msra.mxu1 %vm2832_vm5, %v2556_v25  ;;  %2129 = vmatprep.subr.msk.bf16.mxu0 %vm2832_vm5, %v2558_v26 }
 0x1ee   :  { %2177 = vmatprep.subr.msk.bf16.mxu1 %vm2832_vm5, %v2569_v30 }
 0x1f4   :  { %2132 = vmatpush3.bf16.xpose.msk.msra.mxu0 %vm2832_vm5, %v2581_v34 }
 0x1f5   :  { %2180 = vmatpush3.bf16.xpose.msk.msra.mxu1 %vm2832_vm5, %v2594_v38  ;;  %2135 = vmatprep.subr.msk.bf16.mxu0 %vm2832_vm5, %v2596_v39 }
 0x1f6   :  { %2183 = vmatprep.subr.msk.bf16.mxu1 %vm2832_vm5, %v2608_v43 }
 0x1fc   :  { %2138 = vmatpush3.bf16.xpose.msk.msra.mxu0 %vm2832_vm5, %v2629_v50 }
 0x1fd   :  { %2186 = vmatpush3.bf16.xpose.msk.msra.mxu1 %vm2832_vm5, %v2633_v51  ;;  %2141 = vmatprep.subr.msk.bf16.mxu0 %vm2832_vm5, %v2635_v52 }
 0x1fe   :  { %2189 = vmatprep.subr.msk.bf16.mxu1 %vm2832_vm5, %v2647_v56 }
 0x204   :  { %2144 = vmatpush3.bf16.xpose.msk.msra.mxu0 %vm2832_vm5, %v2665_v62 }
 0x205   :  { %2192 = vmatpush3.bf16.xpose.msk.msra.mxu1 %vm2832_vm5, %v2669_v63  ;;  %2147 = vmatprep.subr.msk.bf16.mxu0 %vm2832_vm5, %v2671_v0 }
 0x206   :  { %2195 = vmatprep.subr.msk.bf16.mxu1 %vm2832_vm5, %v2683_v5 }
 0x20c   :  { %2150 = vmatpush3.bf16.xpose.msk.msra.mxu0 %vm2832_vm5, %v2701_v14 }
 0x20d   :  { %2198 = vmatpush3.bf16.xpose.msk.msra.mxu1 %vm2832_vm5, %v2711_v19  ;;  %2153 = vmatprep.subr.msk.bf16.mxu0 %vm2832_vm5, %v2713_v20 }
 0x20e   :  { %2201 = vmatprep.subr.msk.bf16.mxu1 %vm2832_vm5, %v2724_v24 }
 0x214   :  { %2156 = vmatpush3.bf16.xpose.msk.msra.mxu0 %vm2832_vm5, %v2744_v35 }
 0x215   :  { %2204 = vmatpush3.bf16.xpose.msk.msra.mxu1 %vm2832_vm5, %v2748_v36  ;;  %2159 = vmatprep.subr.msk.bf16.mxu0 %vm2832_vm5, %v2750_v37 }
 0x216   :  { %2207 = vmatprep.subr.msk.bf16.mxu1 %vm2832_vm5, %v2759_v42 }
 0x21c   :  { %2162 = vmatpush3.bf16.xpose.msk.msra.mxu0 %vm2832_vm5, %v2768_v46 }
 0x21d   :  { %2210 = vmatpush3.bf16.xpose.msk.msra.mxu1 %vm2832_vm5, %v2772_v47  ;;  %2212 = vmatprep.subr.bf16.mxu0 %v2491_v3 }
 0x21e   :  { %2244 = vmatprep.subr.bf16.mxu1 %v2502_v7 }
 0x2b1   :  { %v495_v57 = vpop.f32.mrb[4].mxu0 }
 0x2b2   :  { %v496_v58 = vadd.f32 %v495_v57, %v2938_v54  ;;  %v579_v59 = vpop.f32.mrb[4].mxu1  ;;  %v2025_v60 = vpop.f32.mrb[5].mxu0 }
 0x2b3   :  { %v580_v1 = vadd.f32 %v579_v59, %v2940_v55  ;;  %v2030_v4 = vpop.f32.mrb[5].mxu1 }
 0x2b4   :  { %v1575_v9 = vmul.f32 -1.442695, %v496_v58 }
 0x2b5   :  { %v1577_v10 = vmul.f32 -1.442695, %v580_v1 }
 0x2b6   :  { %2381 = vpow2.f32 %v1575_v9 }
 0x2b7   :  { %2383 = vpow2.f32 %v1577_v10 }
 0x2c0   :  { %v2382_v11 = vpop.eup %2381 }
 0x2c1   :  { %v2384_v13 = vpop.eup %2383  ;;  %v502_v15 = vadd.f32 1.0, %v2382_v11 }
 0x2c2   :  { %v586_v18 = vadd.f32 1.0, %v2384_v13 }
 0x2c3   :  { %2385 = vrcp.f32 %v502_v15 }
 0x2c4   :  { %2387 = vrcp.f32 %v586_v18 }
 0x2cd   :  { %v2386_v27 = vpop.eup %2385 }
 0x2ce   :  { %v2388_v28 = vpop.eup %2387  ;;  %1829 = vmatprep.mubr.msk.f32.mxu0 %vm589_vm3, %v2386_v27 }
 0x2cf   :  { %1863 = vmatprep.mubr.msk.f32.mxu1 %vm589_vm3, %v2388_v28  ;;  %1830 = vmatmul.mubr.msk.f32.vlgmr.msra.gmra.mrb[6].mxu0 %vm589_vm3, %v2386_v27 }
 0x2d0   :  { %1864 = vmatmul.mubr.msk.f32.vlgmr.msra.gmra.mrb[6].mxu1 %vm589_vm3, %v2388_v28  ;;  %2214 = vmatpush3.bf16.msra.mxu0 %v2504_v8 }
 0x2d1   :  { %2246 = vmatpush3.bf16.msra.mxu1 %v2516_v12  ;;  %2216 = vmatprep.subr.bf16.mxu0 %v2529_v16 }
 0x2d2   :  { %2248 = vmatprep.subr.bf16.mxu1 %v2531_v17  ;;  %1010 = vmatprep.mubr.f32.mxu0 %v944_v29 }
 0x2d3   :  { %1080 = vmatprep.mubr.f32.mxu1 %v944_v29 }
 0x2d4   :  { %2218 = vmatpush3.bf16.msra.mxu0 %v2543_v21 }
 0x2d5   :  { %2250 = vmatpush3.bf16.msra.mxu1 %v2556_v25  ;;  %2220 = vmatprep.subr.bf16.mxu0 %v2558_v26 }
 0x2d6   :  { %2252 = vmatprep.subr.bf16.mxu1 %v2569_v30 }
 0x2d8   :  { %2222 = vmatpush3.bf16.msra.mxu0 %v2581_v34 }
 0x2d9   :  { %2254 = vmatpush3.bf16.msra.mxu1 %v2594_v38  ;;  %2224 = vmatprep.subr.bf16.mxu0 %v2596_v39 }
 0x2da   :  { %2256 = vmatprep.subr.bf16.mxu1 %v2608_v43 }
 0x2dc   :  { %2226 = vmatpush3.bf16.msra.mxu0 %v2629_v50 }
 0x2dd   :  { %2258 = vmatpush3.bf16.msra.mxu1 %v2633_v51  ;;  %2228 = vmatprep.subr.bf16.mxu0 %v2635_v52 }
 0x2de   :  { %2260 = vmatprep.subr.bf16.mxu1 %v2647_v56 }
 0x2e0   :  { %2230 = vmatpush3.bf16.msra.mxu0 %v2665_v62 }
 0x2e1   :  { %2262 = vmatpush3.bf16.msra.mxu1 %v2669_v63  ;;  %2232 = vmatprep.subr.bf16.mxu0 %v2671_v0 }
 0x2e2   :  { %2264 = vmatprep.subr.bf16.mxu1 %v2683_v5 }
 0x2e4   :  { %2234 = vmatpush3.bf16.msra.mxu0 %v2701_v14 }
 0x2e5   :  { %2266 = vmatpush3.bf16.msra.mxu1 %v2711_v19  ;;  %2236 = vmatprep.subr.bf16.mxu0 %v2713_v20 }
 0x2e6   :  { %2268 = vmatprep.subr.bf16.mxu1 %v2724_v24 }
 0x2e8   :  { %2238 = vmatpush3.bf16.msra.mxu0 %v2744_v35 }
 0x2e9   :  { %2270 = vmatpush3.bf16.msra.mxu1 %v2748_v36  ;;  %2240 = vmatprep.subr.bf16.mxu0 %v2750_v37 }
 0x2ea   :  { %2272 = vmatprep.subr.bf16.mxu1 %v2759_v42 }
 0x2ec   :  { %2242 = vmatpush3.bf16.msra.mxu0 %v2768_v46 }
 0x2ed   :  { %2274 = vmatpush3.bf16.msra.mxu1 %v2772_v47  ;;  %2031 = vmatprep.subr.mxu0 %v2421_v48 }
 0x2ee   :  { %2036 = vmatprep.subr.mxu1 %v2421_v48 }
 0x2ef   :  { %1011 = vmatmul.mubr.f32.vlgmr.msra.gmra.mrb[8].mxu0 %v2947_v22 }
 0x2f0   :  { %1081 = vmatmul.mubr.f32.vlgmr.msra.gmra.mrb[8].mxu1 %v2947_v22  ;;  %2033 = vmatprep.mubr.msk.f32.mxu0 %vm2422_vm0, %v2421_v48 }
 0x2f1   :  { %2038 = vmatprep.mubr.msk.f32.mxu1 %vm2422_vm0, %v2421_v48 }
 0x3a2   :  { %v755_v31 = vpop.f32.mrb[6].mxu0 }
 0x3a3   :  { %v925_v32 = vpop.f32.mrb[6].mxu1  ;;  %v757_v33 = vpop.f32.mrb[7].mxu0 }
 0x3a4   :  { %v937_v40 = vcombine.low %v755_v31, %v757_v33  ;;  %v927_v41 = vpop.f32.mrb[7].mxu1 }
 0x3a5   :  { %v932_v45 = vcombine.low %v925_v32, %v927_v41 }
 0x3a7   :  { %v934_v57 = vmul.f32 %v932_v45, %v2721_v23 }
 0x3a9   :  { %v939_v58 = vmul.f32 %v937_v40, %v934_v57 }
 0x3ab   :  { %940 = vst [vmem:[#allocation2] sm:$0xff] %v939_v58 }
 0x3c2   :  { %v1897_v59 = vpop.f32.mrb[8].mxu0 }
 0x3c3   :  { %v1932_v60 = vpop.f32.mrb[8].mxu1  ;;  %v1898_v1 = vpop.f32.mrb[9].mxu0 }
 0x3c4   :  { %v1899_v4 = vadd.f32 %v1898_v1, %v1897_v59  ;;  %v1933_v9 = vpop.f32.mrb[9].mxu1 }
 0x3c5   :  { %v1934_v10 = vadd.f32 %v1933_v9, %v1932_v60 }
 0x3c6   :  { %2032 = vmatpush3.msk.msra.mxu0 %vm260_vm1, %v1899_v4 }
 0x3c7   :  { %2037 = vmatpush3.msk.msra.mxu1 %vm260_vm1, %v1934_v10  ;;  %2034 = vmatmul.mubr.msk.f32.vlgmr.msra.gmra.mrb[10].mxu0 %vm256_vm2, %v2794_v61 }
 0x3c8   :  { %2039 = vmatmul.mubr.msk.f32.vlgmr.msra.gmra.mrb[10].mxu1 %vm256_vm2, %v2799_v2  ;;  %2041 = vmatprep.subr.mxu0 %v2421_v48 }
 0x3c9   :  { %2046 = vmatprep.subr.mxu1 %v2421_v48  ;;  %2043 = vmatprep.mubr.msk.f32.mxu0 %vm2422_vm0, %v2421_v48 }
 0x3ca   :  { %2048 = vmatprep.mubr.msk.f32.mxu1 %vm2422_vm0, %v2421_v48 }
 0x49a   :  { %v1155_v23 = vpop.f32.mrb[10].mxu0 }
 0x49b   :  { %v1156_v11 = vadd.f32 %v1155_v23, %v2816_v6  ;;  %v1228_v13 = vpop.f32.mrb[10].mxu1  ;;  %v2035_v15 = vpop.f32.mrb[11].mxu0 }
 0x49c   :  { %v1229_v61 = vadd.f32 %v1228_v13, %v2816_v6  ;;  %v2040_v18 = vpop.f32.mrb[11].mxu1 }
 0x49d   :  { %v1232_v27 = vadd.f32 3.0, %v1156_v11 }
 0x49e   :  { %v1237_v2 = vadd.f32 3.0, %v1229_v61 }
 0x49f   :  { %v1233_v28 = vmax.f32 %v1232_v27, 0.0 }
 0x4a0   :  { %v1238_v29 = vmax.f32 %v1237_v2, 0.0 }
 0x4a1   :  { %v1234_v31 = vmin.f32 %v1233_v28, 6.0 }
 0x4a2   :  { %v1239_v32 = vmin.f32 %v1238_v29, 6.0 }
 0x4a3   :  { %v1235_v33 = vmul.f32 0.16666667, %v1234_v31 }
 0x4a4   :  { %v1240_v40 = vmul.f32 0.16666667, %v1239_v32 }
 0x4a5   :  { %v1236_v41 = vmul.f32 %v1235_v33, %v1156_v11 }
 0x4a6   :  { %v1241_v45 = vmul.f32 %v1240_v40, %v1229_v61 }
 0x4a7   :  { %2042 = vmatpush3.msra.mxu0 %v1236_v41 }
 0x4a8   :  { %2047 = vmatpush3.msra.mxu1 %v1241_v45  ;;  %2044 = vmatmul.mubr.msk.f32.vlgmr.msra.gmra.mrb[12].mxu0 %vm425_vm4, %v2823_v44 }
 0x4a9   :  { %2049 = vmatmul.mubr.msk.f32.vlgmr.msra.gmra.mrb[12].mxu1 %vm425_vm4, %v2828_v49  ;;  %2277 = vmatprep.subr.msk.bf16.mxu0 %vm2832_vm5, %v2491_v3 }
 0x4aa   :  { %2325 = vmatprep.subr.msk.bf16.mxu1 %vm2832_vm5, %v2502_v7 }
 0x4ae   :  { %2280 = vmatpush3.bf16.xpose.msk.msra.mxu0 %vm2832_vm5, %v2504_v8 }
 0x4af   :  { %2328 = vmatpush3.bf16.xpose.msk.msra.mxu1 %vm2832_vm5, %v2516_v12  ;;  %2283 = vmatprep.subr.msk.bf16.mxu0 %vm2832_vm5, %v2529_v16 }
 0x4b0   :  { %2331 = vmatprep.subr.msk.bf16.mxu1 %vm2832_vm5, %v2531_v17 }
 0x4b6   :  { %2286 = vmatpush3.bf16.xpose.msk.msra.mxu0 %vm2832_vm5, %v2543_v21 }
 0x4b7   :  { %2334 = vmatpush3.bf16.xpose.msk.msra.mxu1 %vm2832_vm5, %v2556_v25  ;;  %2289 = vmatprep.subr.msk.bf16.mxu0 %vm2832_vm5, %v2558_v26 }
 0x4b8   :  { %2337 = vmatprep.subr.msk.bf16.mxu1 %vm2832_vm5, %v2569_v30 }
 0x4be   :  { %2292 = vmatpush3.bf16.xpose.msk.msra.mxu0 %vm2832_vm5, %v2581_v34 }
 0x4bf   :  { %2340 = vmatpush3.bf16.xpose.msk.msra.mxu1 %vm2832_vm5, %v2594_v38  ;;  %2295 = vmatprep.subr.msk.bf16.mxu0 %vm2832_vm5, %v2596_v39 }
 0x4c0   :  { %2343 = vmatprep.subr.msk.bf16.mxu1 %vm2832_vm5, %v2608_v43 }
 0x4c6   :  { %2298 = vmatpush3.bf16.xpose.msk.msra.mxu0 %vm2832_vm5, %v2629_v50 }
 0x4c7   :  { %2346 = vmatpush3.bf16.xpose.msk.msra.mxu1 %vm2832_vm5, %v2633_v51  ;;  %2301 = vmatprep.subr.msk.bf16.mxu0 %vm2832_vm5, %v2635_v52 }
 0x4c8   :  { %2349 = vmatprep.subr.msk.bf16.mxu1 %vm2832_vm5, %v2647_v56 }
 0x4ce   :  { %2304 = vmatpush3.bf16.xpose.msk.msra.mxu0 %vm2832_vm5, %v2665_v62 }
 0x4cf   :  { %2352 = vmatpush3.bf16.xpose.msk.msra.mxu1 %vm2832_vm5, %v2669_v63  ;;  %2307 = vmatprep.subr.msk.bf16.mxu0 %vm2832_vm5, %v2671_v0 }
 0x4d0   :  { %2355 = vmatprep.subr.msk.bf16.mxu1 %vm2832_vm5, %v2683_v5 }
 0x4d6   :  { %2310 = vmatpush3.bf16.xpose.msk.msra.mxu0 %vm2832_vm5, %v2701_v14 }
 0x4d7   :  { %2358 = vmatpush3.bf16.xpose.msk.msra.mxu1 %vm2832_vm5, %v2711_v19  ;;  %2313 = vmatprep.subr.msk.bf16.mxu0 %vm2832_vm5, %v2713_v20 }
 0x4d8   :  { %2361 = vmatprep.subr.msk.bf16.mxu1 %vm2832_vm5, %v2724_v24 }
 0x4de   :  { %2316 = vmatpush3.bf16.xpose.msk.msra.mxu0 %vm2832_vm5, %v2744_v35 }
 0x4df   :  { %2364 = vmatpush3.bf16.xpose.msk.msra.mxu1 %vm2832_vm5, %v2748_v36  ;;  %2319 = vmatprep.subr.msk.bf16.mxu0 %vm2832_vm5, %v2750_v37 }
 0x4e0   :  { %2367 = vmatprep.subr.msk.bf16.mxu1 %vm2832_vm5, %v2759_v42 }
 0x4e6   :  { %2322 = vmatpush3.bf16.xpose.msk.msra.mxu0 %vm2832_vm5, %v2768_v46 }
 0x4e7   :  { %2370 = vmatpush3.bf16.xpose.msk.msra.mxu1 %vm2832_vm5, %v2772_v47 }
 0x57b   :  { %v1308_v3 = vpop.f32.mrb[12].mxu0 }
 0x57c   :  { %v1309_v7 = vadd.f32 %v1308_v3, %v2938_v54  ;;  %v1384_v8 = vpop.f32.mrb[12].mxu1  ;;  %v2045_v12 = vpop.f32.mrb[13].mxu0 }
 0x57d   :  { %v1385_v16 = vadd.f32 %v1384_v8, %v2940_v55  ;;  %v2050_v17 = vpop.f32.mrb[13].mxu1 }
 0x57e   :  { %v1650_v21 = vmul.f32 -1.442695, %v1309_v7 }
 0x57f   :  { %v1652_v25 = vmul.f32 -1.442695, %v1385_v16 }
 0x580   :  { %2389 = vpow2.f32 %v1650_v21 }
 0x581   :  { %2391 = vpow2.f32 %v1652_v25 }
 0x58a   :  { %v2390_v26 = vpop.eup %2389 }
 0x58b   :  { %v2392_v30 = vpop.eup %2391  ;;  %v1315_v34 = vadd.f32 1.0, %v2390_v26 }
 0x58c   :  { %v1391_v38 = vadd.f32 1.0, %v2392_v30 }
 0x58d   :  { %2393 = vrcp.f32 %v1315_v34 }
 0x58e   :  { %2395 = vrcp.f32 %v1391_v38 }
 0x597   :  { %v2394_v39 = vpop.eup %2393 }
 0x598   :  { %v2396_v43 = vpop.eup %2395  ;;  %1975 = vmatprep.mubr.msk.f32.mxu0 %vm589_vm3, %v2394_v39 }
 0x599   :  { %2009 = vmatprep.mubr.msk.f32.mxu1 %vm589_vm3, %v2396_v43  ;;  %1976 = vmatmul.mubr.msk.f32.vlgmr.msra.gmra.mrb[14].mxu0 %vm589_vm3, %v2394_v39 }
 0x59a   :  { %2010 = vmatmul.mubr.msk.f32.vlgmr.msra.gmra.mrb[14].mxu1 %vm589_vm3, %v2396_v43 }
 0x66c   :  { %v1463_v50 = vpop.f32.mrb[14].mxu0 }
 0x66d   :  { %v1537_v51 = vpop.f32.mrb[14].mxu1  ;;  %v1465_v52 = vpop.f32.mrb[15].mxu0 }
 0x66e   :  { %v1549_v56 = vcombine.low %v1463_v50, %v1465_v52  ;;  %v1539_v62 = vpop.f32.mrb[15].mxu1 }
 0x66f   :  { %v1544_v63 = vcombine.low %v1537_v51, %v1539_v62 }
 0x671   :  { %v1546_v0 = vmul.f32 %v2947_v22, %v1544_v63 }
 0x673   :  { %v1551_v5 = vmul.f32 %v1549_v56, %v1546_v0 }
 0x675   :  { %1553 = vst [vmem:[#allocation2 + $0x8] sm:$0xff] %v1551_v5 }
 0x676   :  { %2408 = shalt.err (!%p2405_p4)
}
 0x677   :  { %s2409_s14 = scalar_lea.hbm %s3137_s10, 256 }
 0x678   :  { %p2410_p5 = scmp.ne.s32.totalorder %s3137_s10, %s2409_s14  ;;  %p2413_p6 = scmp.lt.u32.totalorder %s2409_s14, %s3137_s10 }
 0x67a   :  { %p2415_p7 = pnand %p2413_p6, %p2410_p5 }
 0x67c   :  { %2418 = shalt.err (!%p2415_p7)
}
 0x67d   :  { %s2425_s19 = smov 128   ;;  %s2426_s20 = smov 8  }
 0x67e   :  { %1565 = dma.vmem_to_hbm [thread:$0]  %s1560_s30, 256, %s3137_s10, [#allocation3], %s2425_s19, %s2425_s19, %s2426_s20  }
 0x67f   :  { %2419 = dma.done.wait [#allocation3], 256  }
 0x680   :  { %2420 = vsyncadd [#allocation3], 4294967040 }
 0x681   :  { %1569 = vsyncpa [#allocation3], 1 }

// kernel: tpu_custom_call.1
= control target key start
LH: loop header
LB: loop body
LE: loop exit
PB: predicated region body
PF: predicated region fallthrough
CT: control target
= control target key end

     0   :  { %s3127_s0 = inlined_call_operand.vmem [shape: f32[2,4,256], index: 0, kind: input, shape index: {}]   ;;  %s3128_s1 = inlined_call_operand.vmem [shape: f32[256,16], index: 1, kind: input, shape index: {}]   ;;  %s3129_s2 = inlined_call_operand.vmem [shape: f32[256,16], index: 2, kind: input, shape index: {}]   ;;  %s3130_s3 = inlined_call_operand.vmem [shape: f32[8,4], index: 3, kind: input, shape index: {}]   ;;  %s3131_s4 = inlined_call_operand.vmem [shape: f32[8,4], index: 4, kind: input, shape index: {}]   ;;  %s3132_s5 = inlined_call_operand.vmem [shape: f32[8,1], index: 5, kind: input, shape index: {}]   ;;  %s3133_s6 = inlined_call_operand.vmem [shape: f32[4,8], index: 6, kind: input, shape index: {}]   ;;  %s3134_s7 = inlined_call_operand.vmem [shape: f32[4,1], index: 7, kind: input, shape index: {}]   ;;  %s3135_s8 = inlined_call_operand.vmem [shape: f32[4,8], index: 8, kind: input, shape index: {}]   ;;  %s3136_s9 = inlined_call_operand.vmem [shape: f32[4,1], index: 9, kind: input, shape index: {}]   ;;  %s3137_s10 = inlined_call_operand.hbm [shape: f32[2,4,256], index: 10, kind: output, shape index: {}]  }
   0x1   :  { %v52_v0 = vld [vmem:[%s3128_s1 + $0x80] sm:$0xff]  ;;  %v53_v1 = vld [vmem:[%s3128_s1 + $0x88] sm:$0xff]  ;;  %v54_v11 = vld [vmem:[%s3128_s1 + $0x90] sm:$0xff] }
   0x2   :  { %v84_v2 = vld [vmem:[%s3129_s2 + $0x80] sm:$0xff]  ;;  %v2491_v3 = vpack.c.bf16 %v53_v1, %v52_v0  ;;  %v85_v4 = vld [vmem:[%s3129_s2 + $0x88] sm:$0xff]  ;;  %v55_v13 = vld [vmem:[%s3128_s1 + $0x98] sm:$0xff] }
   0x3   :  { %v36_v5 = vld [vmem:[%s3128_s1] sm:$0xff]  ;;  %v37_v6 = vld [vmem:[%s3128_s1 + $0x8] sm:$0xff]  ;;  %v2502_v7 = vpack.c.bf16 %v85_v4, %v84_v2  ;;  %v86_v14 = vld [vmem:[%s3129_s2 + $0x90] sm:$0xff]  ;;  %v2529_v16 = vpack.c.bf16 %v55_v13, %v54_v11 }
   0x4   :  { %v2504_v8 = vpack.c.bf16 %v37_v6, %v36_v5  ;;  %v68_v9 = vld [vmem:[%s3129_s2] sm:$0xff]  ;;  %v69_v10 = vld [vmem:[%s3129_s2 + $0x8] sm:$0xff]  ;;  %2052 = vmatprep.subr.bf16.mxu0 %v2491_v3  ;;  %v87_v15 = vld [vmem:[%s3129_s2 + $0x98] sm:$0xff] }
   0x5   :  { %v2516_v12 = vpack.c.bf16 %v69_v10, %v68_v9  ;;  %2084 = vmatprep.subr.bf16.mxu1 %v2502_v7  ;;  %v2531_v17 = vpack.c.bf16 %v87_v15, %v86_v14  ;;  %v38_v18 = vld [vmem:[%s3128_s1 + $0x10] sm:$0xff]  ;;  %v39_v19 = vld [vmem:[%s3128_s1 + $0x18] sm:$0xff]  ;;  %v56_v23 = vld [vmem:[%s3128_s1 + $0xa0] sm:$0xff] }
   0x6   :  { %2054 = vmatpush3.bf16.msra.mxu0 %v2504_v8  ;;  %v70_v20 = vld [vmem:[%s3129_s2 + $0x10] sm:$0xff]  ;;  %v2543_v21 = vpack.c.bf16 %v39_v19, %v38_v18  ;;  %v71_v22 = vld [vmem:[%s3129_s2 + $0x18] sm:$0xff]  ;;  %v57_v24 = vld [vmem:[%s3128_s1 + $0xa8] sm:$0xff] }
   0x7   :  { %2086 = vmatpush3.bf16.msra.mxu1 %v2516_v12  ;;  %2056 = vmatprep.subr.bf16.mxu0 %v2529_v16  ;;  %v2556_v25 = vpack.c.bf16 %v71_v22, %v70_v20  ;;  %v2558_v26 = vpack.c.bf16 %v57_v24, %v56_v23  ;;  %v88_v27 = vld [vmem:[%s3129_s2 + $0xa0] sm:$0xff]  ;;  %v89_v28 = vld [vmem:[%s3129_s2 + $0xa8] sm:$0xff]  ;;  %v58_v35 = vld [vmem:[%s3128_s1 + $0xb0] sm:$0xff] }
   0x8   :  { %2088 = vmatprep.subr.bf16.mxu1 %v2531_v17  ;;  %v40_v29 = vld [vmem:[%s3128_s1 + $0x20] sm:$0xff]  ;;  %v2569_v30 = vpack.c.bf16 %v89_v28, %v88_v27  ;;  %v41_v31 = vld [vmem:[%s3128_s1 + $0x28] sm:$0xff]  ;;  %v59_v36 = vld [vmem:[%s3128_s1 + $0xb8] sm:$0xff] }
   0x9   :  { %v72_v32 = vld [vmem:[%s3129_s2 + $0x20] sm:$0xff]  ;;  %v73_v33 = vld [vmem:[%s3129_s2 + $0x28] sm:$0xff]  ;;  %v2581_v34 = vpack.c.bf16 %v41_v31, %v40_v29  ;;  %v90_v37 = vld [vmem:[%s3129_s2 + $0xb0] sm:$0xff]  ;;  %v2596_v39 = vpack.c.bf16 %v59_v36, %v58_v35 }
   0xa   :  { %2058 = vmatpush3.bf16.msra.mxu0 %v2543_v21  ;;  %v2594_v38 = vpack.c.bf16 %v73_v33, %v72_v32  ;;  %v91_v40 = vld [vmem:[%s3129_s2 + $0xb8] sm:$0xff]  ;;  %v42_v41 = vld [vmem:[%s3128_s1 + $0x30] sm:$0xff]  ;;  %v60_v46 = vld [vmem:[%s3128_s1 + $0xc0] sm:$0xff] }
   0xb   :  { %2090 = vmatpush3.bf16.msra.mxu1 %v2556_v25  ;;  %2060 = vmatprep.subr.bf16.mxu0 %v2558_v26  ;;  %v43_v42 = vld [vmem:[%s3128_s1 + $0x38] sm:$0xff]  ;;  %v2608_v43 = vpack.c.bf16 %v91_v40, %v90_v37  ;;  %v74_v44 = vld [vmem:[%s3129_s2 + $0x30] sm:$0xff]  ;;  %v61_v47 = vld [vmem:[%s3128_s1 + $0xc8] sm:$0xff] }
   0xc   :  { %2092 = vmatprep.subr.bf16.mxu1 %v2569_v30  ;;  %v75_v45 = vld [vmem:[%s3129_s2 + $0x38] sm:$0xff]  ;;  %v92_v48 = vld [vmem:[%s3129_s2 + $0xc0] sm:$0xff]  ;;  %v93_v49 = vld [vmem:[%s3129_s2 + $0xc8] sm:$0xff]  ;;  %v2629_v50 = vpack.c.bf16 %v43_v42, %v42_v41  ;;  %v2635_v52 = vpack.c.bf16 %v61_v47, %v60_v46 }
   0xd   :  { %v2633_v51 = vpack.c.bf16 %v75_v45, %v74_v44  ;;  %v44_v53 = vld [vmem:[%s3128_s1 + $0x40] sm:$0xff]  ;;  %v45_v54 = vld [vmem:[%s3128_s1 + $0x48] sm:$0xff]  ;;  %v2647_v56 = vpack.c.bf16 %v93_v49, %v92_v48  ;;  %v62_v58 = vld [vmem:[%s3128_s1 + $0xd0] sm:$0xff] }
   0xe   :  { %2062 = vmatpush3.bf16.msra.mxu0 %v2581_v34  ;;  %v76_v55 = vld [vmem:[%s3129_s2 + $0x40] sm:$0xff]  ;;  %v77_v57 = vld [vmem:[%s3129_s2 + $0x48] sm:$0xff]  ;;  %v63_v59 = vld [vmem:[%s3128_s1 + $0xd8] sm:$0xff]  ;;  %v2665_v62 = vpack.c.bf16 %v45_v54, %v44_v53 }
   0xf   :  { %2094 = vmatpush3.bf16.msra.mxu1 %v2594_v38  ;;  %2064 = vmatprep.subr.bf16.mxu0 %v2596_v39  ;;  %v94_v60 = vld [vmem:[%s3129_s2 + $0xd0] sm:$0xff]  ;;  %v95_v61 = vld [vmem:[%s3129_s2 + $0xd8] sm:$0xff]  ;;  %v2669_v63 = vpack.c.bf16 %v77_v57, %v76_v55  ;;  %v2671_v0 = vpack.c.bf16 %v63_v59, %v62_v58  ;;  %v64_v9 = vld [vmem:[%s3128_s1 + $0xe0] sm:$0xff] }
  0x10   :  { %2096 = vmatprep.subr.bf16.mxu1 %v2608_v43  ;;  %v46_v1 = vld [vmem:[%s3128_s1 + $0x50] sm:$0xff]  ;;  %v47_v2 = vld [vmem:[%s3128_s1 + $0x58] sm:$0xff]  ;;  %v2683_v5 = vpack.c.bf16 %v95_v61, %v94_v60  ;;  %v65_v10 = vld [vmem:[%s3128_s1 + $0xe8] sm:$0xff] }
  0x11   :  { %v78_v4 = vld [vmem:[%s3129_s2 + $0x50] sm:$0xff]  ;;  %v79_v6 = vld [vmem:[%s3129_s2 + $0x58] sm:$0xff]  ;;  %v96_v11 = vld [vmem:[%s3129_s2 + $0xe0] sm:$0xff]  ;;  %v2701_v14 = vpack.c.bf16 %v47_v2, %v46_v1  ;;  %v2713_v20 = vpack.c.bf16 %v65_v10, %v64_v9 }
  0x12   :  { %2066 = vmatpush3.bf16.msra.mxu0 %v2629_v50  ;;  %v97_v13 = vld [vmem:[%s3129_s2 + $0xe8] sm:$0xff]  ;;  %v48_v15 = vld [vmem:[%s3128_s1 + $0x60] sm:$0xff]  ;;  %v2711_v19 = vpack.c.bf16 %v79_v6, %v78_v4 }
  0x13   :  { %2098 = vmatpush3.bf16.msra.mxu1 %v2633_v51  ;;  %2068 = vmatprep.subr.bf16.mxu0 %v2635_v52  ;;  %v49_v18 = vld [vmem:[%s3128_s1 + $0x68] sm:$0xff]  ;;  %v80_v22 = vld [vmem:[%s3129_s2 + $0x60] sm:$0xff] }
  0x14   :  { %2100 = vmatprep.subr.bf16.mxu1 %v2647_v56  ;;  %v2721_v23 = vld [vmem:[%s3127_s0] sm:$0xff] }
  0x16   :  { %2070 = vmatpush3.bf16.msra.mxu0 %v2665_v62 }
  0x17   :  { %2102 = vmatpush3.bf16.msra.mxu1 %v2669_v63  ;;  %2072 = vmatprep.subr.bf16.mxu0 %v2671_v0 }
  0x18   :  { %15 = vsyncpa [#allocation3], 0  ;;  %2104 = vmatprep.subr.bf16.mxu1 %v2683_v5  ;;  %v2724_v24 = vpack.c.bf16 %v97_v13, %v96_v11  ;;  %v81_v27 = vld [vmem:[%s3129_s2 + $0x68] sm:$0xff]  ;;  %v66_v28 = vld [vmem:[%s3128_s1 + $0xf0] sm:$0xff]  ;;  %v109_v31 = vcombine.high %v2721_v23, %v2721_v23  ;;  %v2744_v35 = vpack.c.bf16 %v49_v18, %v48_v15  ;;  %v2421_v48 = vmov 0.0  }
  0x19   :  { %v67_v29 = vld [vmem:[%s3128_s1 + $0xf8] sm:$0xff]  ;;  %v98_v32 = vld [vmem:[%s3129_s2 + $0xf0] sm:$0xff]  ;;  %v2748_v36 = vpack.c.bf16 %v81_v27, %v80_v22  ;;  %vm2422_vm0 = vmmov 0   ;;  %v102_v49 = vld [vmem:[%s3132_s5] sm:$0xff]  ;;  %v2423_v53 = vmov 0   ;;  %vm260_vm1 = vcmask 1043456  }
  0x1a   :  { %v99_v33 = vld [vmem:[%s3129_s2 + $0xf8] sm:$0xff]  ;;  %2074 = vmatpush3.bf16.msra.mxu0 %v2701_v14  ;;  %175 = vmatprep.mubr.f32.mxu0 %v109_v31  ;;  %v2750_v37 = vpack.c.bf16 %v67_v29, %v66_v28  ;;  %v50_v40 = vld [vmem:[%s3128_s1 + $0x70] sm:$0xff]  ;;  %v106_v54 = vld [vmem:[%s3136_s9] sm:$0xf]  ;;  %vm256_vm2 = vcmask 31744   ;;  %vm589_vm3 = vcmask 130048  }
  0x1b   :  { %2106 = vmatpush3.bf16.msra.mxu1 %v2711_v19  ;;  %2076 = vmatprep.subr.bf16.mxu0 %v2713_v20  ;;  %v51_v41 = vld [vmem:[%s3128_s1 + $0x78] sm:$0xff]  ;;  %v2759_v42 = vpack.c.bf16 %v99_v33, %v98_v32  ;;  %v82_v44 = vld [vmem:[%s3129_s2 + $0x70] sm:$0xff]  ;;  %v2794_v61 = vld [vmem:[%s3130_s3] sm:$0xff]  ;;  %vm425_vm4 = vcmask 64512  }
  0x1c   :  { %2108 = vmatprep.subr.bf16.mxu1 %v2724_v24  ;;  %v83_v45 = vld [vmem:[%s3129_s2 + $0x78] sm:$0xff]  ;;  %245 = vmatprep.mubr.f32.mxu1 %v109_v31  ;;  %v2768_v46 = vpack.c.bf16 %v51_v41, %v50_v40  ;;  %v2799_v2 = vld [vmem:[%s3131_s4] sm:$0xff]  ;;  %vm2832_vm5 = vmpackc.low %vm589_vm3, %vm589_vm3 }
  0x1d   :  { %v2772_v47 = vpack.c.bf16 %v83_v45, %v82_v44  ;;  %2377 = vset.pattern.permute.xlu0 %v2423_v53  ;;  %2378 = vset.pattern.permute.xlu1 %v2423_v53  ;;  %v104_v4 = vld [vmem:[%s3134_s7] sm:$0xf] }
  0x1e   :  { %2078 = vmatpush3.bf16.msra.mxu0 %v2744_v35  ;;  %253 = vperm.xlu0 %2377, %v102_v49   ;;  %v2823_v44 = vld [vmem:[%s3133_s6] sm:$0xf] }
  0x1f   :  { %2110 = vmatpush3.bf16.msra.mxu1 %v2748_v36  ;;  %2080 = vmatprep.subr.bf16.mxu0 %v2750_v37  ;;  %v2828_v49 = vld [vmem:[%s3135_s8] sm:$0xf] }
  0x20   :  { %2112 = vmatprep.subr.bf16.mxu1 %v2759_v42  ;;  %422 = vperm.xlu1 %2378, %v104_v4  }
  0x22   :  { %2082 = vmatpush3.bf16.msra.mxu0 %v2768_v46  ;;  %507 = vperm.xlu0 %2377, %v106_v54  }
  0x23   :  { %2114 = vmatpush3.bf16.msra.mxu1 %v2772_v47  ;;  %2011 = vmatprep.subr.mxu0 %v2421_v48 }
  0x24   :  { %2016 = vmatprep.subr.mxu1 %v2421_v48 }
  0x25   :  { %176 = vmatmul.mubr.f32.vlgmr.msra.gmra.mrb[0].mxu0 %v2721_v23 }
  0x26   :  { %246 = vmatmul.mubr.f32.vlgmr.msra.gmra.mrb[0].mxu1 %v2721_v23  ;;  %2013 = vmatprep.mubr.msk.f32.mxu0 %vm2422_vm0, %v2421_v48 }
  0x27   :  { %2018 = vmatprep.mubr.msk.f32.mxu1 %vm2422_vm0, %v2421_v48 }
  0x9d   :  { %v2816_v6 = vpop.permute.xlu0 %253 }
  0x9f   :  { %v2938_v54 = vpop.permute.xlu1 %422 }
  0xf8   :  { %v1751_v55 = vpop.f32.mrb[0].mxu0 }
  0xf9   :  { %v1786_v57 = vpop.f32.mrb[0].mxu1  ;;  %v1752_v58 = vpop.f32.mrb[1].mxu0 }
  0xfa   :  { %v1753_v59 = vadd.f32 %v1752_v58, %v1751_v55  ;;  %v1787_v60 = vpop.f32.mrb[1].mxu1  ;;  %v2940_v55 = vpop.permute.xlu0 %507 }
  0xfb   :  { %v1788_v1 = vadd.f32 %v1787_v60, %v1786_v57 }
  0xfc   :  { %2012 = vmatpush3.msk.msra.mxu0 %vm260_vm1, %v1753_v59 }
  0xfd   :  { %2017 = vmatpush3.msk.msra.mxu1 %vm260_vm1, %v1788_v1  ;;  %2014 = vmatmul.mubr.msk.f32.vlgmr.msra.gmra.mrb[2].mxu0 %vm256_vm2, %v2794_v61 }
  0xfe   :  { %2019 = vmatmul.mubr.msk.f32.vlgmr.msra.gmra.mrb[2].mxu1 %vm256_vm2, %v2799_v2  ;;  %2021 = vmatprep.subr.mxu0 %v2421_v48 }
  0xff   :  { %2026 = vmatprep.subr.mxu1 %v2421_v48  ;;  %2023 = vmatprep.mubr.msk.f32.mxu0 %vm2422_vm0, %v2421_v48 }
 0x100   :  { %2028 = vmatprep.mubr.msk.f32.mxu1 %vm2422_vm0, %v2421_v48 }
 0x1d0   :  { %v330_v9 = vpop.f32.mrb[2].mxu0 }
 0x1d1   :  { %v331_v10 = vadd.f32 %v330_v9, %v2816_v6  ;;  %v406_v11 = vpop.f32.mrb[2].mxu1  ;;  %v2015_v13 = vpop.f32.mrb[3].mxu0 }
 0x1d2   :  { %v407_v15 = vadd.f32 %v406_v11, %v2816_v6  ;;  %v2020_v18 = vpop.f32.mrb[3].mxu1 }
 0x1d3   :  { %v410_v22 = vadd.f32 3.0, %v331_v10 }
 0x1d4   :  { %v415_v27 = vadd.f32 3.0, %v407_v15 }
 0x1d5   :  { %v411_v28 = vmax.f32 %v410_v22, 0.0  ;;  %v2947_v22 = vld [vmem:[%s3127_s0 + $0x8] sm:$0xff]  ;;  %s2424_s0 = smov [#allocation2]  }
 0x1d6   :  { %v416_v29 = vmax.f32 %v415_v27, 0.0  ;;  %s1559_s30 = sshll.u32 %s2424_s0, 4  ;;  %s1560_s30 = int_to_ptr.vmem [resolvable:$true] %s1559_s30 }
 0x1d7   :  { %v412_v31 = vmin.f32 %v411_v28, 6.0  ;;  %s2397_s11 = scalar_lea.vmem %s1560_s30, 256  ;;  %p2402_p1 = scmp.lt.s32.totalorder %s1560_s30, %s1560_s30 }
 0x1d8   :  { %v417_v32 = vmin.f32 %v416_v29, 6.0  ;;  %v944_v29 = vcombine.high %v2947_v22, %v2947_v22  ;;  %p2398_p0 = scmp.ne.s32.totalorder %s1560_s30, %s2397_s11  ;;  %p2403_p2 = scmp.lt.s32.totalorder %s2397_s11, %s2397_s11 }
 0x1d9   :  { %v413_v33 = vmul.f32 0.16666667, %v412_v31 }
 0x1da   :  { %v418_v40 = vmul.f32 0.16666667, %v417_v32  ;;  %p2404_p3 = por %p2403_p2, %p2402_p1 }
 0x1db   :  { %v414_v41 = vmul.f32 %v413_v33, %v331_v10 }
 0x1dc   :  { %v419_v45 = vmul.f32 %v418_v40, %v407_v15  ;;  %p2405_p4 = pnand %p2404_p3, %p2398_p0 }
 0x1dd   :  { %2022 = vmatpush3.msra.mxu0 %v414_v41 }
 0x1de   :  { %2027 = vmatpush3.msra.mxu1 %v419_v45  ;;  %2024 = vmatmul.mubr.msk.f32.vlgmr.msra.gmra.mrb[4].mxu0 %vm425_vm4, %v2823_v44 }
 0x1df   :  { %2029 = vmatmul.mubr.msk.f32.vlgmr.msra.gmra.mrb[4].mxu1 %vm425_vm4, %v2828_v49  ;;  %2117 = vmatprep.subr.msk.bf16.mxu0 %vm2832_vm5, %v2491_v3 }
 0x1e0   :  { %2165 = vmatprep.subr.msk.bf16.mxu1 %vm2832_vm5, %v2502_v7 }
 0x1e4   :  { %2120 = vmatpush3.bf16.xpose.msk.msra.mxu0 %vm2832_vm5, %v2504_v8 }
 0x1e5   :  { %2168 = vmatpush3.bf16.xpose.msk.msra.mxu1 %vm2832_vm5, %v2516_v12  ;;  %2123 = vmatprep.subr.msk.bf16.mxu0 %vm2832_vm5, %v2529_v16 }
 0x1e6   :  { %2171 = vmatprep.subr.msk.bf16.mxu1 %vm2832_vm5, %v2531_v17 }
 0x1ec   :  { %2126 = vmatpush3.bf16.xpose.msk.msra.mxu0 %vm2832_vm5, %v2543_v21 }
 0x1ed   :  { %2174 = vmatpush3.bf16.xpose.msk.msra.mxu1 %vm2832_vm5, %v2556_v25  ;;  %2129 = vmatprep.subr.msk.bf16.mxu0 %vm2832_vm5, %v2558_v26 }
 0x1ee   :  { %2177 = vmatprep.subr.msk.bf16.mxu1 %vm2832_vm5, %v2569_v30 }
 0x1f4   :  { %2132 = vmatpush3.bf16.xpose.msk.msra.mxu0 %vm2832_vm5, %v2581_v34 }
 0x1f5   :  { %2180 = vmatpush3.bf16.xpose.msk.msra.mxu1 %vm2832_vm5, %v2594_v38  ;;  %2135 = vmatprep.subr.msk.bf16.mxu0 %vm2832_vm5, %v2596_v39 }
 0x1f6   :  { %2183 = vmatprep.subr.msk.bf16.mxu1 %vm2832_vm5, %v2608_v43 }
 0x1fc   :  { %2138 = vmatpush3.bf16.xpose.msk.msra.mxu0 %vm2832_vm5, %v2629_v50 }
 0x1fd   :  { %2186 = vmatpush3.bf16.xpose.msk.msra.mxu1 %vm2832_vm5, %v2633_v51  ;;  %2141 = vmatprep.subr.msk.bf16.mxu0 %vm2832_vm5, %v2635_v52 }
 0x1fe   :  { %2189 = vmatprep.subr.msk.bf16.mxu1 %vm2832_vm5, %v2647_v56 }
 0x204   :  { %2144 = vmatpush3.bf16.xpose.msk.msra.mxu0 %vm2832_vm5, %v2665_v62 }
 0x205   :  { %2192 = vmatpush3.bf16.xpose.msk.msra.mxu1 %vm2832_vm5, %v2669_v63  ;;  %2147 = vmatprep.subr.msk.bf16.mxu0 %vm2832_vm5, %v2671_v0 }
 0x206   :  { %2195 = vmatprep.subr.msk.bf16.mxu1 %vm2832_vm5, %v2683_v5 }
 0x20c   :  { %2150 = vmatpush3.bf16.xpose.msk.msra.mxu0 %vm2832_vm5, %v2701_v14 }
 0x20d   :  { %2198 = vmatpush3.bf16.xpose.msk.msra.mxu1 %vm2832_vm5, %v2711_v19  ;;  %2153 = vmatprep.subr.msk.bf16.mxu0 %vm2832_vm5, %v2713_v20 }
 0x20e   :  { %2201 = vmatprep.subr.msk.bf16.mxu1 %vm2832_vm5, %v2724_v24 }
 0x214   :  { %2156 = vmatpush3.bf16.xpose.msk.msra.mxu0 %vm2832_vm5, %v2744_v35 }
 0x215   :  { %2204 = vmatpush3.bf16.xpose.msk.msra.mxu1 %vm2832_vm5, %v2748_v36  ;;  %2159 = vmatprep.subr.msk.bf16.mxu0 %vm2832_vm5, %v2750_v37 }
 0x216   :  { %2207 = vmatprep.subr.msk.bf16.mxu1 %vm2832_vm5, %v2759_v42 }
 0x21c   :  { %2162 = vmatpush3.bf16.xpose.msk.msra.mxu0 %vm2832_vm5, %v2768_v46 }
 0x21d   :  { %2210 = vmatpush3.bf16.xpose.msk.msra.mxu1 %vm2832_vm5, %v2772_v47  ;;  %2212 = vmatprep.subr.bf16.mxu0 %v2491_v3 }
 0x21e   :  { %2244 = vmatprep.subr.bf16.mxu1 %v2502_v7 }
 0x2b1   :  { %v495_v57 = vpop.f32.mrb[4].mxu0 }
 0x2b2   :  { %v496_v58 = vadd.f32 %v495_v57, %v2938_v54  ;;  %v579_v59 = vpop.f32.mrb[4].mxu1  ;;  %v2025_v60 = vpop.f32.mrb[5].mxu0 }
 0x2b3   :  { %v580_v1 = vadd.f32 %v579_v59, %v2940_v55  ;;  %v2030_v4 = vpop.f32.mrb[5].mxu1 }
 0x2b4   :  { %v1575_v9 = vmul.f32 -1.442695, %v496_v58 }
 0x2b5   :  { %v1577_v10 = vmul.f32 -1.442695, %v580_v1 }
 0x2b6   :  { %2381 = vpow2.f32 %v1575_v9 }
 0x2b7   :  { %2383 = vpow2.f32 %v1577_v10 }
 0x2c0   :  { %v2382_v11 = vpop.eup %2381 }
 0x2c1   :  { %v2384_v13 = vpop.eup %2383  ;;  %v502_v15 = vadd.f32 1.0, %v2382_v11 }
 0x2c2   :  { %v586_v18 = vadd.f32 1.0, %v2384_v13 }
 0x2c3   :  { %2385 = vrcp.f32 %v502_v15 }
 0x2c4   :  { %2387 = vrcp.f32 %v586_v18 }
 0x2cd   :  { %v2386_v27 = vpop.eup %2385 }
 0x2ce   :  { %v2388_v28 = vpop.eup %2387  ;;  %1829 = vmatprep.mubr.msk.f32.mxu0 %vm589_vm3, %v2386_v27 }
 0x2cf   :  { %1863 = vmatprep.mubr.msk.f32.mxu1 %vm589_vm3, %v2388_v28  ;;  %1830 = vmatmul.mubr.msk.f32.vlgmr.msra.gmra.mrb[6].mxu0 %vm589_vm3, %v2386_v27 }
 0x2d0   :  { %1864 = vmatmul.mubr.msk.f32.vlgmr.msra.gmra.mrb[6].mxu1 %vm589_vm3, %v2388_v28  ;;  %2214 = vmatpush3.bf16.msra.mxu0 %v2504_v8 }
 0x2d1   :  { %2246 = vmatpush3.bf16.msra.mxu1 %v2516_v12  ;;  %2216 = vmatprep.subr.bf16.mxu0 %v2529_v16 }
 0x2d2   :  { %2248 = vmatprep.subr.bf16.mxu1 %v2531_v17  ;;  %1010 = vmatprep.mubr.f32.mxu0 %v944_v29 }
 0x2d3   :  { %1080 = vmatprep.mubr.f32.mxu1 %v944_v29 }
 0x2d4   :  { %2218 = vmatpush3.bf16.msra.mxu0 %v2543_v21 }
 0x2d5   :  { %2250 = vmatpush3.bf16.msra.mxu1 %v2556_v25  ;;  %2220 = vmatprep.subr.bf16.mxu0 %v2558_v26 }
 0x2d6   :  { %2252 = vmatprep.subr.bf16.mxu1 %v2569_v30 }
 0x2d8   :  { %2222 = vmatpush3.bf16.msra.mxu0 %v2581_v34 }
 0x2d9   :  { %2254 = vmatpush3.bf16.msra.mxu1 %v2594_v38  ;;  %2224 = vmatprep.subr.bf16.mxu0 %v2596_v39 }
 0x2da   :  { %2256 = vmatprep.subr.bf16.mxu1 %v2608_v43 }
 0x2dc   :  { %2226 = vmatpush3.bf16.msra.mxu0 %v2629_v50 }
 0x2dd   :  { %2258 = vmatpush3.bf16.msra.mxu1 %v2633_v51  ;;  %2228 = vmatprep.subr.bf16.mxu0 %v2635_v52 }
 0x2de   :  { %2260 = vmatprep.subr.bf16.mxu1 %v2647_v56 }
 0x2e0   :  { %2230 = vmatpush3.bf16.msra.mxu0 %v2665_v62 }
 0x2e1   :  { %2262 = vmatpush3.bf16.msra.mxu1 %v2669_v63  ;;  %2232 = vmatprep.subr.bf16.mxu0 %v2671_v0 }
 0x2e2   :  { %2264 = vmatprep.subr.bf16.mxu1 %v2683_v5 }
 0x2e4   :  { %2234 = vmatpush3.bf16.msra.mxu0 %v2701_v14 }
 0x2e5   :  { %2266 = vmatpush3.bf16.msra.mxu1 %v2711_v19  ;;  %2236 = vmatprep.subr.bf16.mxu0 %v2713_v20 }
 0x2e6   :  { %2268 = vmatprep.subr.bf16.mxu1 %v2724_v24 }
 0x2e8   :  { %2238 = vmatpush3.bf16.msra.mxu0 %v2744_v35 }
 0x2e9   :  { %2270 = vmatpush3.bf16.msra.mxu1 %v2748_v36  ;;  %2240 = vmatprep.subr.bf16.mxu0 %v2750_v37 }
 0x2ea   :  { %2272 = vmatprep.subr.bf16.mxu1 %v2759_v42 }
 0x2ec   :  { %2242 = vmatpush3.bf16.msra.mxu0 %v2768_v46 }
 0x2ed   :  { %2274 = vmatpush3.bf16.msra.mxu1 %v2772_v47  ;;  %2031 = vmatprep.subr.mxu0 %v2421_v48 }
 0x2ee   :  { %2036 = vmatprep.subr.mxu1 %v2421_v48 }
 0x2ef   :  { %1011 = vmatmul.mubr.f32.vlgmr.msra.gmra.mrb[8].mxu0 %v2947_v22 }
 0x2f0   :  { %1081 = vmatmul.mubr.f32.vlgmr.msra.gmra.mrb[8].mxu1 %v2947_v22  ;;  %2033 = vmatprep.mubr.msk.f32.mxu0 %vm2422_vm0, %v2421_v48 }
 0x2f1   :  { %2038 = vmatprep.mubr.msk.f32.mxu1 %vm2422_vm0, %v2421_v48 }
 0x3a2   :  { %v755_v31 = vpop.f32.mrb[6].mxu0 }
 0x3a3   :  { %v925_v32 = vpop.f32.mrb[6].mxu1  ;;  %v757_v33 = vpop.f32.mrb[7].mxu0 }
 0x3a4   :  { %v937_v40 = vcombine.low %v755_v31, %v757_v33  ;;  %v927_v41 = vpop.f32.mrb[7].mxu1 }
 0x3a5   :  { %v932_v45 = vcombine.low %v925_v32, %v927_v41 }
 0x3a7   :  { %v934_v57 = vmul.f32 %v932_v45, %v2721_v23 }
 0x3a9   :  { %v939_v58 = vmul.f32 %v937_v40, %v934_v57 }
 0x3ab   :  { %940 = vst [vmem:[#allocation2] sm:$0xff] %v939_v58 }
 0x3c2   :  { %v1897_v59 = vpop.f32.mrb[8].mxu0 }
 0x3c3   :  { %v1932_v60 = vpop.f32.mrb[8].mxu1  ;;  %v1898_v1 = vpop.f32.mrb[9].mxu0 }
 0x3c4   :  { %v1899_v4 = vadd.f32 %v1898_v1, %v1897_v59  ;;  %v1933_v9 = vpop.f32.mrb[9].mxu1 }
 0x3c5   :  { %v1934_v10 = vadd.f32 %v1933_v9, %v1932_v60 }
 0x3c6   :  { %2032 = vmatpush3.msk.msra.mxu0 %vm260_vm1, %v1899_v4 }
 0x3c7   :  { %2037 = vmatpush3.msk.msra.mxu1 %vm260_vm1, %v1934_v10  ;;  %2034 = vmatmul.mubr.msk.f32.vlgmr.msra.gmra.mrb[10].mxu0 %vm256_vm2, %v2794_v61 }
 0x3c8   :  { %2039 = vmatmul.mubr.msk.f32.vlgmr.msra.gmra.mrb[10].mxu1 %vm256_vm2, %v2799_v2  ;;  %2041 = vmatprep.subr.mxu0 %v2421_v48 }
 0x3c9   :  { %2046 = vmatprep.subr.mxu1 %v2421_v48  ;;  %2043 = vmatprep.mubr.msk.f32.mxu0 %vm2422_vm0, %v2421_v48 }
 0x3ca   :  { %2048 = vmatprep.mubr.msk.f32.mxu1 %vm2422_vm0, %v2421_v48 }
 0x49a   :  { %v1155_v23 = vpop.f32.mrb[10].mxu0 }
 0x49b   :  { %v1156_v11 = vadd.f32 %v1155_v23, %v2816_v6  ;;  %v1228_v13 = vpop.f32.mrb[10].mxu1  ;;  %v2035_v15 = vpop.f32.mrb[11].mxu0 }
 0x49c   :  { %v1229_v61 = vadd.f32 %v1228_v13, %v2816_v6  ;;  %v2040_v18 = vpop.f32.mrb[11].mxu1 }
 0x49d   :  { %v1232_v27 = vadd.f32 3.0, %v1156_v11 }
 0x49e   :  { %v1237_v2 = vadd.f32 3.0, %v1229_v61 }
 0x49f   :  { %v1233_v28 = vmax.f32 %v1232_v27, 0.0 }
 0x4a0   :  { %v1238_v29 = vmax.f32 %v1237_v2, 0.0 }
 0x4a1   :  { %v1234_v31 = vmin.f32 %v1233_v28, 6.0 }
 0x4a2   :  { %v1239_v32 = vmin.f32 %v1238_v29, 6.0 }
 0x4a3   :  { %v1235_v33 = vmul.f32 0.16666667, %v1234_v31 }
 0x4a4   :  { %v1240_v40 = vmul.f32 0.16666667, %v1239_v32 }
 0x4a5   :  { %v1236_v41 = vmul.f32 %v1235_v33, %v1156_v11 }
 0x4a6   :  { %v1241_v45 = vmul.f32 %v1240_v40, %v1229_v61 }
 0x4a7   :  { %2042 = vmatpush3.msra.mxu0 %v1236_v41 }
 0x4a8   :  { %2047 = vmatpush3.msra.mxu1 %v1241_v45  ;;  %2044 = vmatmul.mubr.msk.f32.vlgmr.msra.gmra.mrb[12].mxu0 %vm425_vm4, %v2823_v44 }
 0x4a9   :  { %2049 = vmatmul.mubr.msk.f32.vlgmr.msra.gmra.mrb[12].mxu1 %vm425_vm4, %v2828_v49  ;;  %2277 = vmatprep.subr.msk.bf16.mxu0 %vm2832_vm5, %v2491_v3 }
 0x4aa   :  { %2325 = vmatprep.subr.msk.bf16.mxu1 %vm2832_vm5, %v2502_v7 }
 0x4ae   :  { %2280 = vmatpush3.bf16.xpose.msk.msra.mxu0 %vm2832_vm5, %v2504_v8 }
 0x4af   :  { %2328 = vmatpush3.bf16.xpose.msk.msra.mxu1 %vm2832_vm5, %v2516_v12  ;;  %2283 = vmatprep.subr.msk.bf16.mxu0 %vm2832_vm5, %v2529_v16 }
 0x4b0   :  { %2331 = vmatprep.subr.msk.bf16.mxu1 %vm2832_vm5, %v2531_v17 }
 0x4b6   :  { %2286 = vmatpush3.bf16.xpose.msk.msra.mxu0 %vm2832_vm5, %v2543_v21 }
 0x4b7   :  { %2334 = vmatpush3.bf16.xpose.msk.msra.mxu1 %vm2832_vm5, %v2556_v25  ;;  %2289 = vmatprep.subr.msk.bf16.mxu0 %vm2832_vm5, %v2558_v26 }
 0x4b8   :  { %2337 = vmatprep.subr.msk.bf16.mxu1 %vm2832_vm5, %v2569_v30 }
 0x4be   :  { %2292 = vmatpush3.bf16.xpose.msk.msra.mxu0 %vm2832_vm5, %v2581_v34 }
 0x4bf   :  { %2340 = vmatpush3.bf16.xpose.msk.msra.mxu1 %vm2832_vm5, %v2594_v38  ;;  %2295 = vmatprep.subr.msk.bf16.mxu0 %vm2832_vm5, %v2596_v39 }
 0x4c0   :  { %2343 = vmatprep.subr.msk.bf16.mxu1 %vm2832_vm5, %v2608_v43 }
 0x4c6   :  { %2298 = vmatpush3.bf16.xpose.msk.msra.mxu0 %vm2832_vm5, %v2629_v50 }
 0x4c7   :  { %2346 = vmatpush3.bf16.xpose.msk.msra.mxu1 %vm2832_vm5, %v2633_v51  ;;  %2301 = vmatprep.subr.msk.bf16.mxu0 %vm2832_vm5, %v2635_v52 }
 0x4c8   :  { %2349 = vmatprep.subr.msk.bf16.mxu1 %vm2832_vm5, %v2647_v56 }
 0x4ce   :  { %2304 = vmatpush3.bf16.xpose.msk.msra.mxu0 %vm2832_vm5, %v2665_v62 }
 0x4cf   :  { %2352 = vmatpush3.bf16.xpose.msk.msra.mxu1 %vm2832_vm5, %v2669_v63  ;;  %2307 = vmatprep.subr.msk.bf16.mxu0 %vm2832_vm5, %v2671_v0 }
 0x4d0   :  { %2355 = vmatprep.subr.msk.bf16.mxu1 %vm2832_vm5, %v2683_v5 }
 0x4d6   :  { %2310 = vmatpush3.bf16.xpose.msk.msra.mxu0 %vm2832_vm5, %v2701_v14 }
 0x4d7   :  { %2358 = vmatpush3.bf16.xpose.msk.msra.mxu1 %vm2832_vm5, %v2711_v19  ;;  %2313 = vmatprep.subr.msk.bf16.mxu0 %vm2832_vm5, %v2713_v20 }
 0x4d8   :  { %2361 = vmatprep.subr.msk.bf16.mxu1 %vm2832_vm5, %v2724_v24 }
 0x4de   :  { %2316 = vmatpush3.bf16.xpose.msk.msra.mxu0 %vm2832_vm5, %v2744_v35 }
 0x4df   :  { %2364 = vmatpush3.bf16.xpose.msk.msra.mxu1 %vm2832_vm5, %v2748_v36  ;;  %2319 = vmatprep.subr.msk.bf16.mxu0 %vm2832_vm5, %v2750_v37 }
 0x4e0   :  { %2367 = vmatprep.subr.msk.bf16.mxu1 %vm2832_vm5, %v2759_v42 }
 0x4e6   :  { %2322 = vmatpush3.bf16.xpose.msk.msra.mxu0 %vm2832_vm5, %v2768_v46 }
 0x4e7   :  { %2370 = vmatpush3.bf16.xpose.msk.msra.mxu1 %vm2832_vm5, %v2772_v47 }
 0x57b   :  { %v1308_v3 = vpop.f32.mrb[12].mxu0 }
 0x57c   :  { %v1309_v7 = vadd.f32 %v1308_v3, %v2938_v54  ;;  %v1384_v8 = vpop.f32.mrb[12].mxu1  ;;  %v2045_v12 = vpop.f32.mrb[13].mxu0 }
 0x57d   :  { %v1385_v16 = vadd.f32 %v1384_v8, %v2940_v55  ;;  %v2050_v17 = vpop.f32.mrb[13].mxu1 }
 0x57e   :  { %v1650_v21 = vmul.f32 -1.442695, %v1309_v7 }
 0x57f   :  { %v1652_v25 = vmul.f32 -1.442695, %v1385_v16 }
 0x580   :  { %2389 = vpow2.f32 %v1650_v21 }
 0x581   :  { %2391 = vpow2.f32 %v1652_v25 }
 0x58a   :  { %v2390_v26 = vpop.eup %2389 }
 0x58b   :  { %v2392_v30 = vpop.eup %2391  ;;  %v1315_v34 = vadd.f32 1.0, %v2390_v26 }
 0x58c   :  { %v1391_v38 = vadd.f32 1.0, %v2392_v30 }
 0x58d   :  { %2393 = vrcp.f32 %v1315_v34 }
 0x58e   :  { %2395 = vrcp.f32 %v1391_v38 }
 0x597   :  { %v2394_v39 = vpop.eup %2393 }
 0x598   :  { %v2396_v43 = vpop.eup %2395  ;;  %1975 = vmatprep.mubr.msk.f32.mxu0 %vm589_vm3, %v2394_v39 }
 0x599   :  { %2009 = vmatprep.mubr.msk.f32.mxu1 %vm589_vm3, %v2396_v43  ;;  %1976 = vmatmul.mubr.msk.f32.vlgmr.msra.gmra.mrb[14].mxu0 %vm589_vm3, %v2394_v39 }
 0x59a   :  { %2010 = vmatmul.mubr.msk.f32.vlgmr.msra.gmra.mrb[14].mxu1 %vm589_vm3, %v2396_v43 }
 0x66c   :  { %v1463_v50 = vpop.f32.mrb[14].mxu0 }
 0x66d   :  { %v1537_v51 = vpop.f32.mrb[14].mxu1  ;;  %v1465_v52 = vpop.f32.mrb[15].mxu0 }
 0x66e   :  { %v1549_v56 = vcombine.low %v1463_v50, %v1465_v52  ;;  %v1539_v62 = vpop.f32.mrb[15].mxu1 }
 0x66f   :  { %v1544_v63 = vcombine.low %v1537_v51, %v1539_v62 }
 0x671   :  { %v1546_v0 = vmul.f32 %v2947_v22, %v1544_v63 }
 0x673   :  { %v1551_v5 = vmul.f32 %v1549_v56, %v1546_v0 }
 0x675   :  { %1553 = vst [vmem:[#allocation2 + $0x8] sm:$0xff] %v1551_v5 }
 0x676   :  { %2408 = shalt.err (!%p2405_p4)
}
 0x677   :  { %s2409_s14 = scalar_lea.hbm %s3137_s10, 256 }
 0x678   :  { %p2410_p5 = scmp.ne.s32.totalorder %s3137_s10, %s2409_s14  ;;  %p2413_p6 = scmp.lt.u32.totalorder %s2409_s14, %s3137_s10 }
 0x67a   :  { %p2415_p7 = pnand %p2413_p6, %p2410_p5 }
 0x67c   :  { %2418 = shalt.err (!%p2415_p7)
}
 0x67d   :  { %s2425_s19 = smov 128   ;;  %s2426_s20 = smov 8  }
 0x67e   :  { %1565 = dma.vmem_to_hbm [thread:$0]  %s1560_s30, 256, %s3137_s10, [#allocation3], %s2425_s19, %s2425_s19, %s2426_s20  }
 0x67f   :  { %2419 = dma.done.wait [#allocation3], 256  }
 0x680   :  { %2420 = vsyncadd [#allocation3], 4294967040 }
 0x681   :  { %1569 = vsyncpa [#allocation3], 1 }

</bundles_post_ra>
